<compile_context>
chip_gen: v7x
topology: tpu7x:2x2x1
jax: 0.10.0
libtpu: 0.0.40
codegen_flags: <defaults>
</compile_context>

<pallas_src>
import functools

import jax
import jax.numpy as jnp
from jax.experimental import pallas as pl
from jax.experimental.pallas import tpu as pltpu

EPS = 1e-5


def _round_up(x, m):
    return (x + m - 1) // m * m


@functools.lru_cache(maxsize=None)
def _multi_tensorcore():
    """True on parts where one Pallas grid spans 2 TensorCores (v4, v7x)."""
    try:
        kind = jax.devices()[0].device_kind.lower()
    except Exception:
        return False
    return any(tag in kind for tag in ("v4", "v7", "7x"))


# ---------------------------------------------------------------------------
# Pallas kernels
# ---------------------------------------------------------------------------

def _matmul_bn_kernel(a_ref, b_ref, bias_ref, *rest, relu, has_residual):
    """out = maybe_relu(A @ B + bias [+ residual]).

    A/B are bf16 (BN scale pre-folded into B's columns), accumulation and the
    epilogue run in f32, the store is bf16.
    """
    if has_residual:
        r_ref, o_ref = rest
    else:
        (o_ref,) = rest
    acc = jnp.dot(a_ref[...], b_ref[...], preferred_element_type=jnp.float32)
    out = acc + bias_ref[...]
    if has_residual:
        out = out + r_ref[...].astype(jnp.float32)
    if relu:
        out = jnp.maximum(out, 0.0)
    o_ref[...] = out.astype(o_ref.dtype)


def _head_kernel(x_ref, w_ref, b_ref, o_ref):
    # x_ref: (N, H*W, C); AdaptiveAvgPool2d((1,1)) then Linear(512, 10).
    pooled = jnp.mean(x_ref[...].astype(jnp.float32), axis=1)          # (N, C)
    o_ref[...] = (jnp.dot(pooled.astype(jnp.bfloat16), w_ref[...],
                          preferred_element_type=jnp.float32)
                  + b_ref[...])


# ---------------------------------------------------------------------------
# Pallas wrappers
# ---------------------------------------------------------------------------

def fused_matmul_bn(a, b, bias, residual=None, relu=True):
    """(M,Kp)@(Kp,N) + bias (+ residual), optional ReLU.

    `a` arrives already lane-dense in K (im2col appends the zero tap), `b` is
    bf16 with the BN scale folded in.  On multi-TC parts the grid is split
    across N (weight-heavy layers) or M (activation-heavy layers) so both
    cores share the DMA load; on single-TC parts the grid stays (1, 1).
    """
    M, Kp = a.shape
    Kp_b, N = b.shape
    assert Kp == Kp_b, (Kp, Kp_b)

    multi_tc = _multi_tensorcore()
    # Split B's columns across cores when each half is still >= 128 lanes.
    ngrid = 2 if (multi_tc and N >= 256) else 1
    nblk = N // ngrid

    TM = min(512, _round_up(M, 16))
    # Activation-heavy layers (conv1/layer1): give the second core an M block
    # instead (weights there are small, so duplicating B is cheap).
    if multi_tc and ngrid == 1 and M >= 128 and TM == M:
        TM //= 2
    Mpad = _round_up(M, TM)

    a_p = a if Mpad == M else jnp.pad(a, ((0, Mpad - M), (0, 0)))
    args = [a_p, b, bias]
    in_specs = [
        pl.BlockSpec((TM, Kp), lambda i, j: (i, 0)),
        pl.BlockSpec((Kp, nblk), lambda i, j: (0, j)),
        pl.BlockSpec((1, nblk), lambda i, j: (0, j)),
    ]
    if residual is not None:
        r_p = residual if Mpad == M else jnp.pad(residual,
                                                 ((0, Mpad - M), (0, 0)))
        args.append(r_p)
        in_specs.append(pl.BlockSpec((TM, nblk), lambda i, j: (i, j)))

    kernel = functools.partial(_matmul_bn_kernel, relu=relu,
                               has_residual=residual is not None)
    out = pl.pallas_call(
        kernel,
        out_shape=jax.ShapeDtypeStruct((Mpad, N), jnp.bfloat16),
        grid=(Mpad // TM, ngrid),
        in_specs=in_specs,
        out_specs=pl.BlockSpec((TM, nblk), lambda i, j: (i, j)),
        compiler_params=pltpu.CompilerParams(
            dimension_semantics=("parallel", "parallel")),
    )(*args)
    return out[:M] if Mpad != M else out


def _im2col(x, k, stride, pad, kp):
    # x: (N, H, W, C) bf16 -> (N*Ho*Wo, kp), tap order (kh, kw, C), zero tap
    # appended so K is lane-dense (multiple of 128) with no extra pad copy.
    N, H, W, C = x.shape
    Ho = (H + 2 * pad - k) // stride + 1
    Wo = (W + 2 * pad - k) // stride + 1
    xp = jnp.pad(x, ((0, 0), (pad, pad), (pad, pad), (0, 0)))
    taps = []
    for i in range(k):
        for j in range(k):
            taps.append(xp[:, i:i + Ho * stride:stride, j:j + Wo * stride:stride, :])
    kk = k * k * C
    if kp > kk:
        taps.append(jnp.zeros((N, Ho, Wo, kp - kk), x.dtype))
    patches = jnp.concatenate(taps, axis=-1)                     # (N, Ho, Wo, kp)
    return patches.reshape(N * Ho * Wo, kp), (N, Ho, Wo)


def conv_bn(x, p, stride, relu=True, residual=None):
    cin = p['cin']
    if x.shape[-1] != cin:
        x = x[..., :cin]   # drop stored zero-padded channels (fused into the tap slices)
    kp, nout = p['w'].shape
    patches, (N, Ho, Wo) = _im2col(x, p['k'], stride, p['pad'], kp)
    res = None if residual is None else residual.reshape(N * Ho * Wo, -1)
    out = fused_matmul_bn(patches, p['w'], p['bias'], residual=res, relu=relu)
    return out.reshape(N, Ho, Wo, nout)


def maxpool2d_3x3_s2_p1(x):
    # MaxPool2d(kernel_size=3, stride=2, padding=1), -inf implicit padding.
    # Running jnp.maximum over the 9 taps in the wrapper (XLA fuses it, pure
    # VPU) -- avoids materializing a (M, 9, C) tensor and an extra launch.
    N, H, W, C = x.shape
    k, s, p = 3, 2, 1
    Ho = (H + 2 * p - k) // s + 1
    Wo = (W + 2 * p - k) // s + 1
    xp = jnp.pad(x, ((0, 0), (p, p), (p, p), (0, 0)), constant_values=-jnp.inf)
    out = None
    for i in range(k):
        for j in range(k):
            tap = xp[:, i:i + Ho * s:s, j:j + Wo * s:s, :]
            out = tap if out is None else jnp.maximum(out, tap)
    return out


def avgpool_fc(x, w_fc_t, b_fc):
    # x: (N, H, W, 512) bf16 -> global average pool + Linear(512, 10), fused.
    N, H, W, C = x.shape
    num_out = w_fc_t.shape[1]
    xr = x.reshape(N, H * W, C)
    return pl.pallas_call(
        _head_kernel,
        out_shape=jax.ShapeDtypeStruct((N, num_out), jnp.float32),
        grid=(1,),
        in_specs=[pl.BlockSpec((N, H * W, C), lambda i: (0, 0, 0)),
                  pl.BlockSpec((C, num_out), lambda i: (0, 0)),
                  pl.BlockSpec((1, num_out), lambda i: (0, 0))],
        out_specs=pl.BlockSpec((N, num_out), lambda i: (0, 0)),
    )(xr, w_fc_t, b_fc.reshape(1, num_out).astype(jnp.float32))


# ---------------------------------------------------------------------------
# Parameters (deterministic init; BN folded to eval-mode scale/bias)
# ---------------------------------------------------------------------------

def conv_bn_init(key, cin, cout, k, cin_store=None, cout_store=None):
    """cin_store/cout_store: zero-padded channel counts for lane-dense layout."""
    cin_store = cin if cin_store is None else cin_store
    cout_store = cout if cout_store is None else cout_store
    kw_, kg, kb, km, kv = jax.random.split(key, 5)
    w = jax.random.normal(kw_, (cout, cin, k, k), jnp.float32) * \
        (2.0 / (cin * k * k)) ** 0.5
    gamma = 1.0 + 0.1 * jax.random.normal(kg, (cout,), jnp.float32)
    beta = 0.1 * jax.random.normal(kb, (cout,), jnp.float32)
    mean = 0.1 * jax.random.normal(km, (cout,), jnp.float32)
    var = jax.random.uniform(kv, (cout,), jnp.float32, 0.5, 1.5)
    scale = gamma / jnp.sqrt(var + EPS)
    bias = beta - mean * scale
    if cin_store > cin:                 # lane-dense input taps (e.g. conv1 3->8)
        w = jnp.pad(w, ((0, 0), (0, cin_store - cin), (0, 0), (0, 0)))
    # (Cout, Cin, kh, kw) -> (kh, kw, Cin, Cout) -> (kh*kw*Cin, Cout)   (== im2col order)
    w_mat = jnp.transpose(w, (2, 3, 1, 0)).reshape(k * k * cin_store, cout)
    w_mat = w_mat * scale[None, :]                 # fold BN scale into weights
    if cout_store > cout:               # lane-dense output stores (64 -> 128)
        w_mat = jnp.pad(w_mat, ((0, 0), (0, cout_store - cout)))
        bias = jnp.pad(bias, (0, cout_store - cout))
    K = k * k * cin_store
    Kp = _round_up(K, 128)              # lane-dense K (zero tap added by im2col)
    w_mat = jnp.pad(w_mat, ((0, Kp - K), (0, 0))).astype(jnp.bfloat16)
    return {'w': w_mat,
            'bias': bias.reshape(1, cout_store).astype(jnp.float32),
            'k': k, 'pad': k // 2, 'cin': cin_store}


def block_init(key, cin, cout, stride):
    k1, k2, k3 = jax.random.split(key, 3)
    cout_store = max(cout, 128)         # keep every stored activation >= 128 lanes
    p = {'conv1': conv_bn_init(k1, cin, cout, 3, cout_store=cout_store),
         'conv2': conv_bn_init(k2, cout, cout, 3, cout_store=cout_store),
         'stride': stride}
    if stride != 1 or cin != cout:
        p['downsample'] = conv_bn_init(k3, cin, cout, 1, cout_store=cout_store)
    return p


def init_resnet18(key):
    keys = jax.random.split(key, 10)
    # conv1: Cin padded 3->8 (lane-dense taps), Cout padded 64->128 (lane-dense stores)
    params = {'conv1': conv_bn_init(keys[0], 3, 64, 7, cin_store=8, cout_store=128)}
    cfg = [(64, 64, 1), (64, 64, 1),
           (64, 128, 2), (128, 128, 1),
           (128, 256, 2), (256, 256, 1),
           (256, 512, 2), (512, 512, 1)]
    params['blocks'] = [block_init(keys[i + 1], cin, cout, s)
                        for i, (cin, cout, s) in enumerate(cfg)]
    kfw, kfb = jax.random.split(keys[9])
    bound = 1.0 / (512 ** 0.5)
    fc_w = jax.random.uniform(kfw, (10, 512), jnp.float32, -bound, bound)
    fc_b = jax.random.uniform(kfb, (10,), jnp.float32, -bound, bound)
    params['fc_w'] = jnp.transpose(fc_w).astype(jnp.bfloat16)   # (512, 10), y = x @ W.T + b
    params['fc_b'] = fc_b
    return params


# ---------------------------------------------------------------------------
# Forward pass (== Net.forward == resnet18 with fc -> Linear(512, 10))
# ---------------------------------------------------------------------------

def basic_block(x, p):
    identity = x
    out = conv_bn(x, p['conv1'], p['stride'], relu=True)
    if 'downsample' in p:
        identity = conv_bn(x, p['downsample'], p['stride'], relu=False)
    # relu(bn2(conv2(out)) + identity), fused into the matmul epilogue
    out = conv_bn(out, p['conv2'], 1, relu=True, residual=identity)
    return out


def resnet18_forward(params, x_nchw):
    # NCHW -> NHWC, inter-layer activations kept in bf16 (halves HBM traffic).
    x = jnp.transpose(x_nchw, (0, 2, 3, 1)).astype(jnp.bfloat16)
    cin1 = params['conv1']['cin']
    if x.shape[-1] < cin1:                                        # pad 3 -> 8 channels
        x = jnp.pad(x, ((0, 0), (0, 0), (0, 0), (0, cin1 - x.shape[-1])))
    x = conv_bn(x, params['conv1'], stride=2, relu=True)          # conv1 + bn1 + relu
    x = maxpool2d_3x3_s2_p1(x)                                    # maxpool
    for bp in params['blocks']:                                   # layer1..layer4
        x = basic_block(x, bp)
    return avgpool_fc(x, params['fc_w'], params['fc_b'])          # avgpool + fc


if __name__ == "__main__":
    key = jax.random.PRNGKey(0)
    pkey, xkey = jax.random.split(key)
    params = init_resnet18(pkey)
    x = jax.random.normal(xkey, (2, 3, 32, 32), jnp.float32)      # NCHW input
    out = resnet18_forward(params, x)
    out = jax.block_until_ready(out)
    assert out.shape == (2, 10) and out.dtype == jnp.float32
    print("KERNEL_OK")
</pallas_src>

<mosaic_0001>
module attributes {stable_mosaic.version = 11 : i64} {
  func.func @_matmul_bn_kernel(%arg0: i32, %arg1: i32, %arg2: memref<512x512xbf16, #tpu.memory_space<vmem>>, %arg3: memref<512x128xbf16, #tpu.memory_space<vmem>>, %arg4: memref<1x128xf32, #tpu.memory_space<vmem>>, %arg5: memref<512x128xbf16, #tpu.memory_space<vmem>>) attributes {dimension_semantics = [#tpu.dimension_semantics<parallel>, #tpu.dimension_semantics<parallel>], iteration_bounds = array<i64: 1, 1>, scalar_prefetch = 0 : i64, scratch_operands = 0 : i64, tpu.core_type = #tpu.core_type<tc>, window_params = [{transform_indices = @transform_0, window_bounds = array<i64: 512, 512>}, {transform_indices = @transform_1, window_bounds = array<i64: 512, 128>}, {transform_indices = @transform_2, window_bounds = array<i64: 1, 128>}, {transform_indices = @transform_3, window_bounds = array<i64: 512, 128>}]} {
    %c0 = arith.constant 0 : index
    %c0_0 = arith.constant 0 : index
    %0 = vector.load %arg2[%c0, %c0_0] : memref<512x512xbf16, #tpu.memory_space<vmem>>, vector<512x512xbf16>
    %c0_1 = arith.constant 0 : index
    %c0_2 = arith.constant 0 : index
    %1 = vector.load %arg3[%c0_1, %c0_2] : memref<512x128xbf16, #tpu.memory_space<vmem>>, vector<512x128xbf16>
    %cst = arith.constant dense<0.000000e+00> : vector<512x128xf32>
    %2 = tpu.matmul %0, %1, %cst {dimension_numbers = #tpu.dot_dimension_numbers<[1], [0], [0], [1], [0, 0, 1, 1], [], []>} : vector<512x512xbf16>, vector<512x128xbf16>, vector<512x128xf32> -> vector<512x128xf32>
    %c0_3 = arith.constant 0 : index
    %c0_4 = arith.constant 0 : index
    %3 = vector.load %arg4[%c0_3, %c0_4] : memref<1x128xf32, #tpu.memory_space<vmem>>, vector<1x128xf32>
    %4 = vector.broadcast %3 : vector<1x128xf32> to vector<512x128xf32>
    %5 = arith.addf %2, %4 : vector<512x128xf32>
    %cst_5 = arith.constant 0.000000e+00 : f32
    %6 = vector.broadcast %cst_5 : f32 to vector<512x128xf32>
    %7 = arith.maximumf %5, %6 : vector<512x128xf32>
    %8 = arith.truncf %7 : vector<512x128xf32> to vector<512x128xbf16>
    %c0_6 = arith.constant 0 : index
    %c0_7 = arith.constant 0 : index
    %9 = vector.load %arg5[%c0_6, %c0_7] : memref<512x128xbf16, #tpu.memory_space<vmem>>, vector<512x128xbf16>
    tpu.vector_store %arg5[%c0_6, %c0_7], %8 {strides = array<i32>} : memref<512x128xbf16, #tpu.memory_space<vmem>>, vector<512x128xbf16>,
    return
  }
  func.func @transform_0(%arg0: i32, %arg1: i32) -> (i32, i32) {
    %c0_i32 = arith.constant 0 : i32
    %c0_i32_0 = arith.constant 0 : i32
    return %arg0, %c0_i32 : i32, i32
  }
  func.func @transform_1(%arg0: i32, %arg1: i32) -> (i32, i32) {
    %c0_i32 = arith.constant 0 : i32
    %c0_i32_0 = arith.constant 0 : i32
    return %c0_i32, %arg1 : i32, i32
  }
  func.func @transform_2(%arg0: i32, %arg1: i32) -> (i32, i32) {
    %c0_i32 = arith.constant 0 : i32
    %c0_i32_0 = arith.constant 0 : i32
    return %c0_i32, %arg1 : i32, i32
  }
  func.func @transform_3(%arg0: i32, %arg1: i32) -> (i32, i32) {
    %c0_i32 = arith.constant 0 : i32
    return %arg0, %arg1 : i32, i32
  }
}

</mosaic_0001>

<bundles_post_ra>
// kernel: tpu_custom_call.1
= control target key start
LH: loop header
LB: loop body
LE: loop exit
PB: predicated region body
PF: predicated region fallthrough
CT: control target
= control target key end

     0   :  { %8 = vsyncpa [#allocation3], 0  ;;  %s3138_s0 = inlined_call_operand.hbm [shape: bf16[512,512], index: 0, kind: input, shape index: {}]   ;;  %s3139_s1 = inlined_call_operand.hbm [shape: bf16[512,128], index: 1, kind: input, shape index: {}]   ;;  %s3140_s2 = inlined_call_operand.vmem [shape: f32[1,128], index: 2, kind: input, shape index: {}]   ;;  %s3141_s3 = inlined_call_operand.hbm [shape: bf16[512,128], index: 3, kind: output, shape index: {}]  }
   0x1   :  { %9 = vsyncpa [#allocation6], 0 }
   0x2   :  { %10 = vsyncpa [#allocation4], 0  ;;  %s2968_s12 = smov [#allocation2]   ;;  %s2896_s16 = scalar_lea.hbm %s3138_s0, 16384 }
   0x3   :  { %s16_s13 = sshll.u32 %s2968_s12, 4  ;;  %p2897_p0 = scmp.ne.s32.totalorder %s3138_s0, %s2896_s16  ;;  %s17_s13 = int_to_ptr.vmem [resolvable:$true] %s16_s13 }
   0x4   :  { %p2900_p1 = scmp.lt.u32.totalorder %s2896_s16, %s3138_s0 }
   0x6   :  { %p2902_p2 = pnand %p2900_p1, %p2897_p0 }
   0x8   :  { %2905 = shalt.err (!%p2902_p2)
}
   0x9   :  { %s2906_s21 = scalar_lea.vmem %s17_s13, 16384  ;;  %p2911_p4 = scmp.lt.s32.totalorder %s17_s13, %s17_s13 }
   0xa   :  { %p2907_p3 = scmp.ne.s32.totalorder %s17_s13, %s2906_s21  ;;  %p2912_p5 = scmp.lt.s32.totalorder %s2906_s21, %s2906_s21 }
   0xc   :  { %p2913_p6 = por %p2912_p5, %p2911_p4 }
   0xe   :  { %p2914_p7 = pnand %p2913_p6, %p2907_p3 }
  0x10   :  { %2917 = shalt.err (!%p2914_p7)
}
  0x11   :  { %s2969_s22 = smov 256   ;;  %s2970_s23 = smov 16  }
  0x12   :  { %22 = dma.hbm_to_vmem [thread:$0]  %s3138_s0, 16384, %s17_s13, [#allocation3], %s2969_s22, %s2969_s22, %s2970_s23  }
  0x13   :  { %s2971_s26 = smov [#allocation5]   ;;  %s2918_s30 = scalar_lea.hbm %s3139_s1, 4096 }
  0x14   :  { %s28_s27 = sshll.u32 %s2971_s26, 4  ;;  %p2919_p8 = scmp.ne.s32.totalorder %s3139_s1, %s2918_s30  ;;  %s29_s27 = int_to_ptr.vmem [resolvable:$true] %s28_s27 }
  0x15   :  { %p2922_p9 = scmp.lt.u32.totalorder %s2918_s30, %s3139_s1 }
  0x17   :  { %p2924_p10 = pnand %p2922_p9, %p2919_p8 }
  0x19   :  { %2927 = shalt.err (!%p2924_p10)
}
  0x1a   :  { %s2928_s8 = scalar_lea.vmem %s29_s27, 4096  ;;  %p2933_p12 = scmp.lt.s32.totalorder %s29_s27, %s29_s27 }
  0x1b   :  { %p2929_p11 = scmp.ne.s32.totalorder %s29_s27, %s2928_s8  ;;  %p2934_p13 = scmp.lt.s32.totalorder %s2928_s8, %s2928_s8 }
  0x1d   :  { %p2935_p0 = por %p2934_p13, %p2933_p12 }
  0x1f   :  { %p2936_p1 = pnand %p2935_p0, %p2929_p11 }
  0x21   :  { %2939 = shalt.err (!%p2936_p1)
}
  0x22   :  { %s2972_s0 = smov 64   ;;  %s2973_s9 = smov 4  }
  0x23   :  { %34 = dma.hbm_to_vmem [thread:$0]  %s3139_s1, 4096, %s29_s27, [#allocation6], %s2972_s0, %s2972_s0, %s2973_s9  }
  0x24   :  { %2962 = dma.done.wait [#allocation3], 16384  }
  0x25   :  { %2963 = vsyncadd [#allocation3], 4294950912 }
  0x26   :  { %2964 = dma.done.wait [#allocation6], 4096  }
  0x27   :  { %2965 = vsyncadd [#allocation6], 4294963200  ;;  %v2974_v0 = vmov 0   ;;  %v2671_v1 = vld [vmem:[#allocation5] sm:$0xff]   ;;  %v2673_v3 = vld [vmem:[#allocation5 + $0x8] sm:$0xff]  }
  0x28   :  { %1075 = vmatprep.subr.bf16.mxu1 %v2974_v0  ;;  %1364 = vmatprep.subr.bf16.mxu0 %v2974_v0  ;;  %v2672_v2 = vld [vmem:[#allocation5 + $0x80] sm:$0xff]   ;;  %v2674_v4 = vld [vmem:[#allocation5 + $0x88] sm:$0xff]   ;;  %v2675_v5 = vld [vmem:[#allocation5 + $0x10] sm:$0xff]  }
  0x29   :  { %1076 = vmatpush1.bf16.msra.mxu1 %v2671_v1  ;;  %1365 = vmatpush1.bf16.msra.mxu0 %v2672_v2  ;;  %v2676_v6 = vld [vmem:[#allocation5 + $0x90] sm:$0xff]   ;;  %v2677_v7 = vld [vmem:[#allocation5 + $0x18] sm:$0xff]   ;;  %v2679_v9 = vld [vmem:[#allocation5 + $0x20] sm:$0xff]  }
  0x2a   :  { %1077 = vmatprep.subr.bf16.mxu1 %v2974_v0  ;;  %1366 = vmatprep.subr.bf16.mxu0 %v2974_v0  ;;  %v2678_v8 = vld [vmem:[#allocation5 + $0x98] sm:$0xff]   ;;  %v2680_v10 = vld [vmem:[#allocation5 + $0xa0] sm:$0xff]   ;;  %v2681_v11 = vld [vmem:[#allocation5 + $0x28] sm:$0xff]  }
  0x2b   :  { %v2682_v12 = vld [vmem:[#allocation5 + $0xa8] sm:$0xff]   ;;  %v2683_v13 = vld [vmem:[#allocation5 + $0x30] sm:$0xff]   ;;  %v2685_v15 = vld [vmem:[#allocation5 + $0x38] sm:$0xff]  }
  0x2c   :  { %v2684_v14 = vld [vmem:[#allocation5 + $0xb0] sm:$0xff]   ;;  %v2686_v16 = vld [vmem:[#allocation5 + $0xb8] sm:$0xff]   ;;  %v2687_v17 = vld [vmem:[#allocation5 + $0x40] sm:$0xff]  }
  0x2d   :  { %1078 = vmatpush1.bf16.msra.mxu1 %v2673_v3  ;;  %1367 = vmatpush1.bf16.msra.mxu0 %v2674_v4  ;;  %v2688_v18 = vld [vmem:[#allocation5 + $0xc0] sm:$0xff]   ;;  %v2689_v20 = vld [vmem:[#allocation5 + $0x48] sm:$0xff]   ;;  %v2691_v23 = vld [vmem:[#allocation5 + $0x50] sm:$0xff]  }
  0x2e   :  { %1079 = vmatprep.subr.bf16.mxu1 %v2974_v0  ;;  %1368 = vmatprep.subr.bf16.mxu0 %v2974_v0  ;;  %v2705_v19 = vld [vmem:[#allocation2 + $0x4] ss:$16 sps:$4 sm:$0xff]   ;;  %v2708_v21 = vld [vmem:[#allocation2 + $0xc] ss:$16 sps:$4 sm:$0xff]   ;;  %v2703_v35 = vld [vmem:[#allocation2] ss:$16 sps:$4 sm:$0xff]  }
  0x2f   :  { %v2690_v22 = vld [vmem:[#allocation5 + $0xc8] sm:$0xff]   ;;  %1107 = vmatprep.mubr.bf16.mxu1 %v2705_v19  ;;  %1396 = vmatprep.mubr.bf16.mxu0 %v2708_v21  ;;  %v2692_v24 = vld [vmem:[#allocation5 + $0xd0] sm:$0xff]   ;;  %v2693_v25 = vld [vmem:[#allocation5 + $0x58] sm:$0xff]  }
  0x30   :  { %v2694_v26 = vld [vmem:[#allocation5 + $0xd8] sm:$0xff]   ;;  %v2695_v27 = vld [vmem:[#allocation5 + $0x60] sm:$0xff]   ;;  %v2697_v29 = vld [vmem:[#allocation5 + $0x68] sm:$0xff]  }
  0x31   :  { %1080 = vmatpush1.bf16.msra.mxu1 %v2675_v5  ;;  %1369 = vmatpush1.bf16.msra.mxu0 %v2676_v6  ;;  %v2696_v28 = vld [vmem:[#allocation5 + $0xe0] sm:$0xff]   ;;  %v2698_v30 = vld [vmem:[#allocation5 + $0xe8] sm:$0xff]   ;;  %v2699_v31 = vld [vmem:[#allocation5 + $0x70] sm:$0xff]  }
  0x32   :  { %1081 = vmatprep.subr.bf16.mxu1 %v2974_v0  ;;  %1370 = vmatprep.subr.bf16.mxu0 %v2974_v0  ;;  %v2700_v32 = vld [vmem:[#allocation5 + $0xf0] sm:$0xff]   ;;  %v2701_v33 = vld [vmem:[#allocation5 + $0x78] sm:$0xff]  }
  0x33   :  { %v2702_v34 = vld [vmem:[#allocation5 + $0xf8] sm:$0xff]   ;;  %v2709_v37 = vld [vmem:[#allocation2 + $0x24] ss:$16 sps:$4 sm:$0xff]   ;;  %v2713_v39 = vld [vmem:[#allocation2 + $0x20] ss:$16 sps:$4 sm:$0xff]  }
  0x34   :  { %v2706_v36 = vld [vmem:[#allocation2 + $0x8] ss:$16 sps:$4 sm:$0xff]   ;;  %v2711_v38 = vld [vmem:[#allocation2 + $0x2c] ss:$16 sps:$4 sm:$0xff]   ;;  %v2715_v41 = vld [vmem:[#allocation2 + $0x44] ss:$16 sps:$4 sm:$0xff]  }
  0x35   :  { %1082 = vmatpush1.bf16.msra.mxu1 %v2677_v7  ;;  %1371 = vmatpush1.bf16.msra.mxu0 %v2678_v8  ;;  %v2714_v40 = vld [vmem:[#allocation2 + $0x28] ss:$16 sps:$4 sm:$0xff]   ;;  %v2717_v42 = vld [vmem:[#allocation2 + $0x4c] ss:$16 sps:$4 sm:$0xff]   ;;  %v2719_v43 = vld [vmem:[#allocation2 + $0x40] ss:$16 sps:$4 sm:$0xff]  }
  0x36   :  { %1083 = vmatprep.subr.bf16.mxu1 %v2974_v0  ;;  %1372 = vmatprep.subr.bf16.mxu0 %v2974_v0  ;;  %v2720_v44 = vld [vmem:[#allocation2 + $0x48] ss:$16 sps:$4 sm:$0xff]   ;;  %v2721_v45 = vld [vmem:[#allocation2 + $0x64] ss:$16 sps:$4 sm:$0xff]   ;;  %v2723_v46 = vld [vmem:[#allocation2 + $0x6c] ss:$16 sps:$4 sm:$0xff]  }
  0x37   :  { %v2725_v47 = vld [vmem:[#allocation2 + $0x60] ss:$16 sps:$4 sm:$0xff]   ;;  %v2726_v48 = vld [vmem:[#allocation2 + $0x68] ss:$16 sps:$4 sm:$0xff]   ;;  %v2727_v49 = vld [vmem:[#allocation2 + $0x84] ss:$16 sps:$4 sm:$0xff]  }
  0x38   :  { %v2729_v50 = vld [vmem:[#allocation2 + $0x8c] ss:$16 sps:$4 sm:$0xff]   ;;  %v2731_v51 = vld [vmem:[#allocation2 + $0x80] ss:$16 sps:$4 sm:$0xff]   ;;  %v2732_v52 = vld [vmem:[#allocation2 + $0x88] ss:$16 sps:$4 sm:$0xff]  }
  0x39   :  { %1084 = vmatpush1.bf16.msra.mxu1 %v2679_v9  ;;  %1373 = vmatpush1.bf16.msra.mxu0 %v2680_v10  ;;  %v2733_v53 = vld [vmem:[#allocation2 + $0xa4] ss:$16 sps:$4 sm:$0xff]   ;;  %v2735_v54 = vld [vmem:[#allocation2 + $0xac] ss:$16 sps:$4 sm:$0xff]   ;;  %v2737_v55 = vld [vmem:[#allocation2 + $0xa0] ss:$16 sps:$4 sm:$0xff]  }
  0x3a   :  { %1085 = vmatprep.subr.bf16.mxu1 %v2974_v0  ;;  %1374 = vmatprep.subr.bf16.mxu0 %v2974_v0  ;;  %v2738_v56 = vld [vmem:[#allocation2 + $0xa8] ss:$16 sps:$4 sm:$0xff]   ;;  %v2739_v57 = vld [vmem:[#allocation2 + $0xc4] ss:$16 sps:$4 sm:$0xff]   ;;  %v2741_v58 = vld [vmem:[#allocation2 + $0xcc] ss:$16 sps:$4 sm:$0xff]  }
  0x3b   :  { %v2743_v59 = vld [vmem:[#allocation2 + $0xc0] ss:$16 sps:$4 sm:$0xff]   ;;  %v2744_v60 = vld [vmem:[#allocation2 + $0xc8] ss:$16 sps:$4 sm:$0xff]   ;;  %v2745_v61 = vld [vmem:[#allocation2 + $0xe4] ss:$16 sps:$4 sm:$0xff]  }
  0x3c   :  { %v2747_v62 = vld [vmem:[#allocation2 + $0xec] ss:$16 sps:$4 sm:$0xff]   ;;  %v2749_v63 = vld [vmem:[#allocation2 + $0xe0] ss:$16 sps:$4 sm:$0xff]   ;;  %v2751_v1 = vld [vmem:[#allocation2 + $0x104] ss:$16 sps:$4 sm:$0xff]  }
  0x3d   :  { %1086 = vmatpush1.bf16.msra.mxu1 %v2681_v11  ;;  %1375 = vmatpush1.bf16.msra.mxu0 %v2682_v12  ;;  %v2753_v2 = vld [vmem:[#allocation2 + $0x10c] ss:$16 sps:$4 sm:$0xff]   ;;  %v2755_v3 = vld [vmem:[#allocation2 + $0x100] ss:$16 sps:$4 sm:$0xff]   ;;  %v2756_v4 = vld [vmem:[#allocation2 + $0x108] ss:$16 sps:$4 sm:$0xff]  }
  0x3e   :  { %1087 = vmatprep.subr.bf16.mxu1 %v2974_v0  ;;  %1376 = vmatprep.subr.bf16.mxu0 %v2974_v0  ;;  %v2757_v5 = vld [vmem:[#allocation2 + $0x124] ss:$16 sps:$4 sm:$0xff]   ;;  %v2759_v6 = vld [vmem:[#allocation2 + $0x12c] ss:$16 sps:$4 sm:$0xff]   ;;  %v2761_v7 = vld [vmem:[#allocation2 + $0x120] ss:$16 sps:$4 sm:$0xff]  }
  0x3f   :  { %v2762_v8 = vld [vmem:[#allocation2 + $0x128] ss:$16 sps:$4 sm:$0xff]   ;;  %v2763_v9 = vld [vmem:[#allocation2 + $0x144] ss:$16 sps:$4 sm:$0xff]   ;;  %v2765_v10 = vld [vmem:[#allocation2 + $0x14c] ss:$16 sps:$4 sm:$0xff]  }
  0x40   :  { %v2767_v11 = vld [vmem:[#allocation2 + $0x140] ss:$16 sps:$4 sm:$0xff]   ;;  %v2768_v12 = vld [vmem:[#allocation2 + $0x148] ss:$16 sps:$4 sm:$0xff]   ;;  %v2781_v21 = vld [vmem:[#allocation2 + $0x1a4] ss:$16 sps:$4 sm:$0xff]  }
  0x41   :  { %1088 = vmatpush1.bf16.msra.mxu1 %v2683_v13  ;;  %1377 = vmatpush1.bf16.msra.mxu0 %v2684_v14  ;;  %v2769_v13 = vld [vmem:[#allocation2 + $0x164] ss:$16 sps:$4 sm:$0xff]   ;;  %v2771_v14 = vld [vmem:[#allocation2 + $0x16c] ss:$16 sps:$4 sm:$0xff]   ;;  %v2779_v19 = vld [vmem:[#allocation2 + $0x180] ss:$16 sps:$4 sm:$0xff]  }
  0x42   :  { %1089 = vmatprep.subr.bf16.mxu1 %v2974_v0  ;;  %1378 = vmatprep.subr.bf16.mxu0 %v2974_v0 }
  0x45   :  { %1090 = vmatpush1.bf16.msra.mxu1 %v2685_v15  ;;  %1379 = vmatpush1.bf16.msra.mxu0 %v2686_v16  ;;  %v2773_v15 = vld [vmem:[#allocation2 + $0x160] ss:$16 sps:$4 sm:$0xff]   ;;  %v2774_v16 = vld [vmem:[#allocation2 + $0x168] ss:$16 sps:$4 sm:$0xff]  }
  0x46   :  { %1091 = vmatprep.subr.bf16.mxu1 %v2974_v0  ;;  %1380 = vmatprep.subr.bf16.mxu0 %v2974_v0 }
  0x49   :  { %1092 = vmatpush1.bf16.msra.mxu1 %v2687_v17  ;;  %1381 = vmatpush1.bf16.msra.mxu0 %v2688_v18  ;;  %v2775_v17 = vld [vmem:[#allocation2 + $0x184] ss:$16 sps:$4 sm:$0xff]   ;;  %v2777_v18 = vld [vmem:[#allocation2 + $0x18c] ss:$16 sps:$4 sm:$0xff]  }
  0x4a   :  { %1093 = vmatprep.subr.bf16.mxu1 %v2974_v0  ;;  %1382 = vmatprep.subr.bf16.mxu0 %v2974_v0 }
  0x4d   :  { %1094 = vmatpush1.bf16.msra.mxu1 %v2689_v20  ;;  %1383 = vmatpush1.bf16.msra.mxu0 %v2690_v22  ;;  %v2780_v20 = vld [vmem:[#allocation2 + $0x188] ss:$16 sps:$4 sm:$0xff]   ;;  %v2783_v22 = vld [vmem:[#allocation2 + $0x1ac] ss:$16 sps:$4 sm:$0xff]  }
  0x4e   :  { %1095 = vmatprep.subr.bf16.mxu1 %v2974_v0  ;;  %1384 = vmatprep.subr.bf16.mxu0 %v2974_v0 }
  0x51   :  { %1096 = vmatpush1.bf16.msra.mxu1 %v2691_v23  ;;  %1385 = vmatpush1.bf16.msra.mxu0 %v2692_v24  ;;  %v2785_v23 = vld [vmem:[#allocation2 + $0x1a0] ss:$16 sps:$4 sm:$0xff]   ;;  %v2786_v24 = vld [vmem:[#allocation2 + $0x1a8] ss:$16 sps:$4 sm:$0xff]  }
  0x52   :  { %1097 = vmatprep.subr.bf16.mxu1 %v2974_v0  ;;  %1386 = vmatprep.subr.bf16.mxu0 %v2974_v0 }
  0x55   :  { %1098 = vmatpush1.bf16.msra.mxu1 %v2693_v25  ;;  %1387 = vmatpush1.bf16.msra.mxu0 %v2694_v26  ;;  %v2787_v25 = vld [vmem:[#allocation2 + $0x1c4] ss:$16 sps:$4 sm:$0xff]   ;;  %v2789_v26 = vld [vmem:[#allocation2 + $0x1cc] ss:$16 sps:$4 sm:$0xff]  }
  0x56   :  { %1099 = vmatprep.subr.bf16.mxu1 %v2974_v0  ;;  %1388 = vmatprep.subr.bf16.mxu0 %v2974_v0 }
  0x59   :  { %1100 = vmatpush1.bf16.msra.mxu1 %v2695_v27  ;;  %1389 = vmatpush1.bf16.msra.mxu0 %v2696_v28  ;;  %v2791_v27 = vld [vmem:[#allocation2 + $0x1c0] ss:$16 sps:$4 sm:$0xff]   ;;  %v2792_v28 = vld [vmem:[#allocation2 + $0x1c8] ss:$16 sps:$4 sm:$0xff]  }
  0x5a   :  { %1101 = vmatprep.subr.bf16.mxu1 %v2974_v0  ;;  %1390 = vmatprep.subr.bf16.mxu0 %v2974_v0 }
  0x5d   :  { %1102 = vmatpush1.bf16.msra.mxu1 %v2697_v29  ;;  %1391 = vmatpush1.bf16.msra.mxu0 %v2698_v30  ;;  %v2793_v29 = vld [vmem:[#allocation2 + $0x1e4] ss:$16 sps:$4 sm:$0xff]   ;;  %v2795_v30 = vld [vmem:[#allocation2 + $0x1ec] ss:$16 sps:$4 sm:$0xff]  }
  0x5e   :  { %1103 = vmatprep.subr.bf16.mxu1 %v2974_v0  ;;  %1392 = vmatprep.subr.bf16.mxu0 %v2974_v0 }
  0x61   :  { %1104 = vmatpush1.bf16.msra.mxu1 %v2699_v31  ;;  %1393 = vmatpush1.bf16.msra.mxu0 %v2700_v32  ;;  %v2797_v31 = vld [vmem:[#allocation2 + $0x1e0] ss:$16 sps:$4 sm:$0xff]   ;;  %v2798_v32 = vld [vmem:[#allocation2 + $0x1e8] ss:$16 sps:$4 sm:$0xff]  }
  0x62   :  { %1105 = vmatprep.subr.bf16.mxu1 %v2974_v0  ;;  %1394 = vmatprep.subr.bf16.mxu0 %v2974_v0  ;;  %v2750_v0 = vld [vmem:[#allocation2 + $0xe8] ss:$16 sps:$4 sm:$0xff]  }
  0x65   :  { %1106 = vmatpush1.bf16.msra.mxu1 %v2701_v33  ;;  %1395 = vmatpush1.bf16.msra.mxu0 %v2702_v34  ;;  %v2799_v33 = vld [vmem:[#allocation2 + $0x204] ss:$16 sps:$4 sm:$0xff]   ;;  %v2801_v34 = vld [vmem:[#allocation2 + $0x20c] ss:$16 sps:$4 sm:$0xff]  }
  0x68   :  { %1108 = vmatmul.mubr.bf16.vlgmr.msra.gmra.mrb[0].mxu1 %v2703_v35  ;;  %1397 = vmatmul.mubr.bf16.vlgmr.msra.gmra.mrb[0].mxu0 %v2706_v36  ;;  %v2803_v35 = vld [vmem:[#allocation2 + $0x200] ss:$16 sps:$4 sm:$0xff]   ;;  %v2804_v36 = vld [vmem:[#allocation2 + $0x208] ss:$16 sps:$4 sm:$0xff]  }
  0x69   :  { %1115 = vmatprep.mubr.bf16.mxu1 %v2709_v37  ;;  %1404 = vmatprep.mubr.bf16.mxu0 %v2711_v38  ;;  %v2805_v37 = vld [vmem:[#allocation2 + $0x224] ss:$16 sps:$4 sm:$0xff]   ;;  %v2807_v38 = vld [vmem:[#allocation2 + $0x22c] ss:$16 sps:$4 sm:$0xff]  }
  0x70   :  { %1116 = vmatmul.mubr.bf16.gmra.mrb[4].mxu1 %v2713_v39  ;;  %1405 = vmatmul.mubr.bf16.gmra.mrb[4].mxu0 %v2714_v40  ;;  %v2809_v39 = vld [vmem:[#allocation2 + $0x220] ss:$16 sps:$4 sm:$0xff]   ;;  %v2810_v40 = vld [vmem:[#allocation2 + $0x228] ss:$16 sps:$4 sm:$0xff]  }
  0x71   :  { %1123 = vmatprep.mubr.bf16.mxu1 %v2715_v41  ;;  %1412 = vmatprep.mubr.bf16.mxu0 %v2717_v42  ;;  %v2811_v41 = vld [vmem:[#allocation2 + $0x244] ss:$16 sps:$4 sm:$0xff]   ;;  %v2813_v42 = vld [vmem:[#allocation2 + $0x24c] ss:$16 sps:$4 sm:$0xff]  }
  0x78   :  { %1124 = vmatmul.mubr.bf16.gmra.mrb[8].mxu1 %v2719_v43  ;;  %1413 = vmatmul.mubr.bf16.gmra.mrb[8].mxu0 %v2720_v44  ;;  %v2815_v43 = vld [vmem:[#allocation2 + $0x240] ss:$16 sps:$4 sm:$0xff]   ;;  %v2816_v44 = vld [vmem:[#allocation2 + $0x248] ss:$16 sps:$4 sm:$0xff]  }
  0x79   :  { %1131 = vmatprep.mubr.bf16.mxu1 %v2721_v45  ;;  %1420 = vmatprep.mubr.bf16.mxu0 %v2723_v46  ;;  %v2817_v45 = vld [vmem:[#allocation2 + $0x264] ss:$16 sps:$4 sm:$0xff]   ;;  %v2819_v46 = vld [vmem:[#allocation2 + $0x26c] ss:$16 sps:$4 sm:$0xff]  }
  0x80   :  { %1132 = vmatmul.mubr.bf16.gmra.mrb[12].mxu1 %v2725_v47  ;;  %1421 = vmatmul.mubr.bf16.gmra.mrb[12].mxu0 %v2726_v48  ;;  %v2821_v47 = vld [vmem:[#allocation2 + $0x260] ss:$16 sps:$4 sm:$0xff]   ;;  %v2822_v48 = vld [vmem:[#allocation2 + $0x268] ss:$16 sps:$4 sm:$0xff]  }
  0x81   :  { %1139 = vmatprep.mubr.bf16.mxu1 %v2727_v49  ;;  %1428 = vmatprep.mubr.bf16.mxu0 %v2729_v50  ;;  %v2823_v49 = vld [vmem:[#allocation2 + $0x284] ss:$16 sps:$4 sm:$0xff]   ;;  %v2825_v50 = vld [vmem:[#allocation2 + $0x28c] ss:$16 sps:$4 sm:$0xff]  }
  0x88   :  { %1140 = vmatmul.mubr.bf16.gmra.mrb[16].mxu1 %v2731_v51  ;;  %1429 = vmatmul.mubr.bf16.gmra.mrb[16].mxu0 %v2732_v52  ;;  %v2827_v51 = vld [vmem:[#allocation2 + $0x280] ss:$16 sps:$4 sm:$0xff]   ;;  %v2828_v52 = vld [vmem:[#allocation2 + $0x288] ss:$16 sps:$4 sm:$0xff]  }
  0x89   :  { %1147 = vmatprep.mubr.bf16.mxu1 %v2733_v53  ;;  %1436 = vmatprep.mubr.bf16.mxu0 %v2735_v54  ;;  %v2829_v53 = vld [vmem:[#allocation2 + $0x2a4] ss:$16 sps:$4 sm:$0xff]   ;;  %v2831_v54 = vld [vmem:[#allocation2 + $0x2ac] ss:$16 sps:$4 sm:$0xff]  }
  0x90   :  { %1148 = vmatmul.mubr.bf16.gmra.mrb[20].mxu1 %v2737_v55  ;;  %1437 = vmatmul.mubr.bf16.gmra.mrb[20].mxu0 %v2738_v56  ;;  %v2833_v55 = vld [vmem:[#allocation2 + $0x2a0] ss:$16 sps:$4 sm:$0xff]   ;;  %v2834_v56 = vld [vmem:[#allocation2 + $0x2a8] ss:$16 sps:$4 sm:$0xff]  }
  0x91   :  { %1155 = vmatprep.mubr.bf16.mxu1 %v2739_v57  ;;  %1444 = vmatprep.mubr.bf16.mxu0 %v2741_v58  ;;  %v2835_v57 = vld [vmem:[#allocation2 + $0x2c4] ss:$16 sps:$4 sm:$0xff]   ;;  %v2837_v58 = vld [vmem:[#allocation2 + $0x2cc] ss:$16 sps:$4 sm:$0xff]  }
  0x98   :  { %1156 = vmatmul.mubr.bf16.gmra.mrb[24].mxu1 %v2743_v59  ;;  %1445 = vmatmul.mubr.bf16.gmra.mrb[24].mxu0 %v2744_v60  ;;  %v2839_v59 = vld [vmem:[#allocation2 + $0x2c0] ss:$16 sps:$4 sm:$0xff]   ;;  %v2840_v60 = vld [vmem:[#allocation2 + $0x2c8] ss:$16 sps:$4 sm:$0xff]  }
  0x99   :  { %1163 = vmatprep.mubr.bf16.mxu1 %v2745_v61  ;;  %1452 = vmatprep.mubr.bf16.mxu0 %v2747_v62  ;;  %v2841_v61 = vld [vmem:[#allocation2 + $0x2e4] ss:$16 sps:$4 sm:$0xff]   ;;  %v2843_v62 = vld [vmem:[#allocation2 + $0x2ec] ss:$16 sps:$4 sm:$0xff]  }
  0xa0   :  { %1164 = vmatmul.mubr.bf16.gmra.mrb[28].mxu1 %v2749_v63  ;;  %1453 = vmatmul.mubr.bf16.gmra.mrb[28].mxu0 %v2750_v0  ;;  %v2845_v63 = vld [vmem:[#allocation2 + $0x2e0] ss:$16 sps:$4 sm:$0xff]   ;;  %v2846_v0 = vld [vmem:[#allocation2 + $0x2e8] ss:$16 sps:$4 sm:$0xff]  }
  0xa1   :  { %1171 = vmatprep.mubr.bf16.mxu1 %v2751_v1  ;;  %1460 = vmatprep.mubr.bf16.mxu0 %v2753_v2  ;;  %v2847_v1 = vld [vmem:[#allocation2 + $0x304] ss:$16 sps:$4 sm:$0xff]   ;;  %v2849_v2 = vld [vmem:[#allocation2 + $0x30c] ss:$16 sps:$4 sm:$0xff]  }
  0xa8   :  { %1172 = vmatmul.mubr.bf16.gmra.mrb[32].mxu1 %v2755_v3  ;;  %1461 = vmatmul.mubr.bf16.gmra.mrb[32].mxu0 %v2756_v4  ;;  %v2851_v3 = vld [vmem:[#allocation2 + $0x300] ss:$16 sps:$4 sm:$0xff]   ;;  %v2852_v4 = vld [vmem:[#allocation2 + $0x308] ss:$16 sps:$4 sm:$0xff]  }
  0xa9   :  { %1179 = vmatprep.mubr.bf16.mxu1 %v2757_v5  ;;  %1468 = vmatprep.mubr.bf16.mxu0 %v2759_v6  ;;  %v2853_v5 = vld [vmem:[#allocation2 + $0x324] ss:$16 sps:$4 sm:$0xff]   ;;  %v2855_v6 = vld [vmem:[#allocation2 + $0x32c] ss:$16 sps:$4 sm:$0xff]  }
  0xb0   :  { %1180 = vmatmul.mubr.bf16.gmra.mrb[36].mxu1 %v2761_v7  ;;  %1469 = vmatmul.mubr.bf16.gmra.mrb[36].mxu0 %v2762_v8  ;;  %v2857_v7 = vld [vmem:[#allocation2 + $0x320] ss:$16 sps:$4 sm:$0xff]   ;;  %v2858_v8 = vld [vmem:[#allocation2 + $0x328] ss:$16 sps:$4 sm:$0xff]  }
  0xb1   :  { %1187 = vmatprep.mubr.bf16.mxu1 %v2763_v9  ;;  %1476 = vmatprep.mubr.bf16.mxu0 %v2765_v10  ;;  %v2859_v9 = vld [vmem:[#allocation2 + $0x344] ss:$16 sps:$4 sm:$0xff]   ;;  %v2861_v10 = vld [vmem:[#allocation2 + $0x34c] ss:$16 sps:$4 sm:$0xff]  }
  0xb8   :  { %1188 = vmatmul.mubr.bf16.gmra.mrb[40].mxu1 %v2767_v11  ;;  %1477 = vmatmul.mubr.bf16.gmra.mrb[40].mxu0 %v2768_v12  ;;  %v2863_v11 = vld [vmem:[#allocation2 + $0x340] ss:$16 sps:$4 sm:$0xff]   ;;  %v2864_v12 = vld [vmem:[#allocation2 + $0x348] ss:$16 sps:$4 sm:$0xff]  }
  0xb9   :  { %1195 = vmatprep.mubr.bf16.mxu1 %v2769_v13  ;;  %1484 = vmatprep.mubr.bf16.mxu0 %v2771_v14  ;;  %v2865_v13 = vld [vmem:[#allocation2 + $0x364] ss:$16 sps:$4 sm:$0xff]   ;;  %v2867_v14 = vld [vmem:[#allocation2 + $0x36c] ss:$16 sps:$4 sm:$0xff]  }
  0xc0   :  { %1196 = vmatmul.mubr.bf16.gmra.mrb[44].mxu1 %v2773_v15  ;;  %1485 = vmatmul.mubr.bf16.gmra.mrb[44].mxu0 %v2774_v16  ;;  %v3058_v15 = vld [vmem:[%s3140_s2] ss:$0 sm:$0xff] }
  0xc1   :  { %1203 = vmatprep.mubr.bf16.mxu1 %v2775_v17  ;;  %1492 = vmatprep.mubr.bf16.mxu0 %v2777_v18 }
  0xc8   :  { %1204 = vmatmul.mubr.bf16.gmra.mrb[48].mxu1 %v2779_v19  ;;  %1493 = vmatmul.mubr.bf16.gmra.mrb[48].mxu0 %v2780_v20  ;;  %v2869_v20 = vld [vmem:[#allocation2 + $0x360] ss:$16 sps:$4 sm:$0xff]  }
  0xc9   :  { %1211 = vmatprep.mubr.bf16.mxu1 %v2781_v21  ;;  %1500 = vmatprep.mubr.bf16.mxu0 %v2783_v22 }
  0xd0   :  { %1212 = vmatmul.mubr.bf16.gmra.mrb[52].mxu1 %v2785_v23  ;;  %1501 = vmatmul.mubr.bf16.gmra.mrb[52].mxu0 %v2786_v24  ;;  %v2870_v23 = vld [vmem:[#allocation2 + $0x368] ss:$16 sps:$4 sm:$0xff]   ;;  %v2871_v24 = vld [vmem:[#allocation2 + $0x384] ss:$16 sps:$4 sm:$0xff]  }
  0xd1   :  { %1219 = vmatprep.mubr.bf16.mxu1 %v2787_v25  ;;  %1508 = vmatprep.mubr.bf16.mxu0 %v2789_v26 }
  0xd8   :  { %1220 = vmatmul.mubr.bf16.gmra.mrb[56].mxu1 %v2791_v27  ;;  %1509 = vmatmul.mubr.bf16.gmra.mrb[56].mxu0 %v2792_v28 }
  0xd9   :  { %1227 = vmatprep.mubr.bf16.mxu1 %v2793_v29  ;;  %1516 = vmatprep.mubr.bf16.mxu0 %v2795_v30  ;;  %v2873_v29 = vld [vmem:[#allocation2 + $0x38c] ss:$16 sps:$4 sm:$0xff]  }
  0xe0   :  { %1228 = vmatmul.mubr.bf16.gmra.mrb[60].mxu1 %v2797_v31  ;;  %1517 = vmatmul.mubr.bf16.gmra.mrb[60].mxu0 %v2798_v32 }
  0xe1   :  { %1235 = vmatprep.mubr.bf16.mxu1 %v2799_v33  ;;  %1524 = vmatprep.mubr.bf16.mxu0 %v2801_v34 }
  0xe8   :  { %1236 = vmatmul.mubr.bf16.gmra.mrb[64].mxu1 %v2803_v35  ;;  %1525 = vmatmul.mubr.bf16.gmra.mrb[64].mxu0 %v2804_v36 }
  0xe9   :  { %1243 = vmatprep.mubr.bf16.mxu1 %v2805_v37  ;;  %1532 = vmatprep.mubr.bf16.mxu0 %v2807_v38 }
  0xf0   :  { %1244 = vmatmul.mubr.bf16.gmra.mrb[68].mxu1 %v2809_v39  ;;  %1533 = vmatmul.mubr.bf16.gmra.mrb[68].mxu0 %v2810_v40  ;;  %v2875_v39 = vld [vmem:[#allocation2 + $0x380] ss:$16 sps:$4 sm:$0xff]  }
  0xf1   :  { %1251 = vmatprep.mubr.bf16.mxu1 %v2811_v41  ;;  %1540 = vmatprep.mubr.bf16.mxu0 %v2813_v42  ;;  %v2876_v42 = vld [vmem:[#allocation2 + $0x388] ss:$16 sps:$4 sm:$0xff]  }
  0xf8   :  { %1252 = vmatmul.mubr.bf16.gmra.mrb[72].mxu1 %v2815_v43  ;;  %1541 = vmatmul.mubr.bf16.gmra.mrb[72].mxu0 %v2816_v44  ;;  %v2877_v43 = vld [vmem:[#allocation2 + $0x3a4] ss:$16 sps:$4 sm:$0xff]  }
  0xf9   :  { %1259 = vmatprep.mubr.bf16.mxu1 %v2817_v45  ;;  %1548 = vmatprep.mubr.bf16.mxu0 %v2819_v46 }
 0x100   :  { %1260 = vmatmul.mubr.bf16.gmra.mrb[76].mxu1 %v2821_v47  ;;  %1549 = vmatmul.mubr.bf16.gmra.mrb[76].mxu0 %v2822_v48  ;;  %v2879_v48 = vld [vmem:[#allocation2 + $0x3ac] ss:$16 sps:$4 sm:$0xff]  }
 0x101   :  { %1267 = vmatprep.mubr.bf16.mxu1 %v2823_v49  ;;  %1556 = vmatprep.mubr.bf16.mxu0 %v2825_v50 }
 0x108   :  { %1268 = vmatmul.mubr.bf16.gmra.mrb[80].mxu1 %v2827_v51  ;;  %1557 = vmatmul.mubr.bf16.gmra.mrb[80].mxu0 %v2828_v52 }
 0x109   :  { %1275 = vmatprep.mubr.bf16.mxu1 %v2829_v53  ;;  %1564 = vmatprep.mubr.bf16.mxu0 %v2831_v54 }
 0x110   :  { %1276 = vmatmul.mubr.bf16.gmra.mrb[84].mxu1 %v2833_v55  ;;  %1565 = vmatmul.mubr.bf16.gmra.mrb[84].mxu0 %v2834_v56 }
 0x111   :  { %1283 = vmatprep.mubr.bf16.mxu1 %v2835_v57  ;;  %1572 = vmatprep.mubr.bf16.mxu0 %v2837_v58  ;;  %v2881_v58 = vld [vmem:[#allocation2 + $0x3a0] ss:$16 sps:$4 sm:$0xff]  }
 0x118   :  { %1284 = vmatmul.mubr.bf16.gmra.mrb[88].mxu1 %v2839_v59  ;;  %1573 = vmatmul.mubr.bf16.gmra.mrb[88].mxu0 %v2840_v60 }
 0x119   :  { %1291 = vmatprep.mubr.bf16.mxu1 %v2841_v61  ;;  %1580 = vmatprep.mubr.bf16.mxu0 %v2843_v62  ;;  %v2882_v61 = vld [vmem:[#allocation2 + $0x3a8] ss:$16 sps:$4 sm:$0xff]   ;;  %v2883_v62 = vld [vmem:[#allocation2 + $0x3c4] ss:$16 sps:$4 sm:$0xff]  }
 0x120   :  { %1292 = vmatmul.mubr.bf16.gmra.mrb[92].mxu1 %v2845_v63  ;;  %1581 = vmatmul.mubr.bf16.gmra.mrb[92].mxu0 %v2846_v0 }
 0x121   :  { %1299 = vmatprep.mubr.bf16.mxu1 %v2847_v1  ;;  %1588 = vmatprep.mubr.bf16.mxu0 %v2849_v2 }
 0x128   :  { %1300 = vmatmul.mubr.bf16.gmra.mrb[96].mxu1 %v2851_v3  ;;  %1589 = vmatmul.mubr.bf16.gmra.mrb[96].mxu0 %v2852_v4  ;;  %v2885_v3 = vld [vmem:[#allocation2 + $0x3cc] ss:$16 sps:$4 sm:$0xff]  }
 0x129   :  { %1307 = vmatprep.mubr.bf16.mxu1 %v2853_v5  ;;  %1596 = vmatprep.mubr.bf16.mxu0 %v2855_v6 }
 0x130   :  { %1308 = vmatmul.mubr.bf16.gmra.mrb[100].mxu1 %v2857_v7  ;;  %1597 = vmatmul.mubr.bf16.gmra.mrb[100].mxu0 %v2858_v8 }
 0x131   :  { %1315 = vmatprep.mubr.bf16.mxu1 %v2859_v9  ;;  %1604 = vmatprep.mubr.bf16.mxu0 %v2861_v10 }
 0x138   :  { %1316 = vmatmul.mubr.bf16.gmra.mrb[104].mxu1 %v2863_v11  ;;  %1605 = vmatmul.mubr.bf16.gmra.mrb[104].mxu0 %v2864_v12 }
 0x139   :  { %1323 = vmatprep.mubr.bf16.mxu1 %v2865_v13  ;;  %1612 = vmatprep.mubr.bf16.mxu0 %v2867_v14  ;;  %v2887_v13 = vld [vmem:[#allocation2 + $0x3c0] ss:$16 sps:$4 sm:$0xff]  }
 0x13b   :  { %v1109_v16 = vpop.f32.mrb[0].mxu1  ;;  %v1398_v18 = vpop.f32.mrb[0].mxu0 }
 0x13c   :  { %v1110_v17 = vadd.f32 %v3058_v15, %v1109_v16  ;;  %v1111_v19 = vpop.f32.mrb[1].mxu1  ;;  %v1400_v21 = vpop.f32.mrb[1].mxu0 }
 0x13d   :  { %v1112_v22 = vpop.f32.mrb[2].mxu1  ;;  %v1401_v27 = vpop.f32.mrb[2].mxu0 }
 0x13e   :  { %v1399_v25 = vadd.f32 %v1398_v18, %v1110_v17  ;;  %v1113_v26 = vadd.f32 %v3058_v15, %v1112_v22  ;;  %v1114_v28 = vpop.f32.mrb[3].mxu1  ;;  %v1403_v30 = vpop.f32.mrb[3].mxu0  ;;  %v2888_v17 = vld [vmem:[#allocation2 + $0x3c8] ss:$16 sps:$4 sm:$0xff]   ;;  %v2889_v18 = vld [vmem:[#allocation2 + $0x3e4] ss:$16 sps:$4 sm:$0xff]  }
 0x140   :  { %v1402_v31 = vadd.f32 %v1401_v27, %v1113_v26  ;;  %1324 = vmatmul.mubr.bf16.gmra.mrb[108].mxu1 %v2869_v20  ;;  %1613 = vmatmul.mubr.bf16.gmra.mrb[108].mxu0 %v2870_v23  ;;  %v1653_v32 = vmax.f32 %v1399_v25, 0.0  ;;  %v2891_v23 = vld [vmem:[#allocation2 + $0x3ec] ss:$16 sps:$4 sm:$0xff]  }
 0x141   :  { %1331 = vmatprep.mubr.bf16.mxu1 %v2871_v24  ;;  %1620 = vmatprep.mubr.bf16.mxu0 %v2873_v29 }
 0x142   :  { %v1654_v33 = vmax.f32 %v1402_v31, 0.0 }
 0x143   :  { %v1117_v34 = vpop.f32.mrb[4].mxu1  ;;  %v1406_v37 = vpop.f32.mrb[4].mxu0 }
 0x144   :  { %v2347_v35 = vpack.c.bf16 %v1654_v33, %v1653_v32  ;;  %v1118_v36 = vadd.f32 %v3058_v15, %v1117_v34  ;;  %v1119_v38 = vpop.f32.mrb[5].mxu1  ;;  %v1408_v40 = vpop.f32.mrb[5].mxu0  ;;  %v2893_v33 = vld [vmem:[#allocation2 + $0x3e0] ss:$16 sps:$4 sm:$0xff]  }
 0x145   :  { %v1120_v41 = vpop.f32.mrb[6].mxu1  ;;  %v1409_v46 = vpop.f32.mrb[6].mxu0 }
 0x146   :  { %2348 = vst [vmem:[#allocation7] sm:$0xff] %v2347_v35   ;;  %v1407_v44 = vadd.f32 %v1406_v37, %v1118_v36  ;;  %v1121_v45 = vadd.f32 %v3058_v15, %v1120_v41  ;;  %v1122_v47 = vpop.f32.mrb[7].mxu1  ;;  %v1411_v49 = vpop.f32.mrb[7].mxu0  ;;  %v2894_v36 = vld [vmem:[#allocation2 + $0x3e8] ss:$16 sps:$4 sm:$0xff]  }
 0x148   :  { %v1410_v50 = vadd.f32 %v1409_v46, %v1121_v45  ;;  %1332 = vmatmul.mubr.bf16.gmra.mrb[112].mxu1 %v2875_v39  ;;  %1621 = vmatmul.mubr.bf16.gmra.mrb[112].mxu0 %v2876_v42  ;;  %v1655_v51 = vmax.f32 %v1407_v44, 0.0 }
 0x149   :  { %1339 = vmatprep.mubr.bf16.mxu1 %v2877_v43  ;;  %1628 = vmatprep.mubr.bf16.mxu0 %v2879_v48 }
 0x14a   :  { %v1656_v52 = vmax.f32 %v1410_v50, 0.0 }
 0x14b   :  { %v1125_v53 = vpop.f32.mrb[8].mxu1  ;;  %v1414_v56 = vpop.f32.mrb[8].mxu0 }
 0x14c   :  { %v2352_v54 = vpack.c.bf16 %v1656_v52, %v1655_v51  ;;  %v1126_v55 = vadd.f32 %v3058_v15, %v1125_v53  ;;  %v1127_v57 = vpop.f32.mrb[9].mxu1  ;;  %v1416_v59 = vpop.f32.mrb[9].mxu0 }
 0x14d   :  { %v1128_v60 = vpop.f32.mrb[10].mxu1  ;;  %v1417_v1 = vpop.f32.mrb[10].mxu0 }
 0x14e   :  { %2504 = vst [vmem:[#allocation7 + $0x8] sm:$0xff] %v2352_v54   ;;  %v1415_v63 = vadd.f32 %v1414_v56, %v1126_v55  ;;  %v1129_v0 = vadd.f32 %v3058_v15, %v1128_v60  ;;  %v1130_v2 = vpop.f32.mrb[11].mxu1  ;;  %v1419_v4 = vpop.f32.mrb[11].mxu0 }
 0x150   :  { %v1418_v5 = vadd.f32 %v1417_v1, %v1129_v0  ;;  %1340 = vmatmul.mubr.bf16.gmra.mrb[116].mxu1 %v2881_v58  ;;  %1629 = vmatmul.mubr.bf16.gmra.mrb[116].mxu0 %v2882_v61  ;;  %v1657_v6 = vmax.f32 %v1415_v63, 0.0 }
 0x151   :  { %1347 = vmatprep.mubr.bf16.mxu1 %v2883_v62  ;;  %1636 = vmatprep.mubr.bf16.mxu0 %v2885_v3 }
 0x152   :  { %v1658_v7 = vmax.f32 %v1418_v5, 0.0 }
 0x153   :  { %v1133_v8 = vpop.f32.mrb[12].mxu1  ;;  %v1422_v11 = vpop.f32.mrb[12].mxu0 }
 0x154   :  { %v2357_v9 = vpack.c.bf16 %v1658_v7, %v1657_v6  ;;  %v1134_v10 = vadd.f32 %v3058_v15, %v1133_v8  ;;  %v1135_v12 = vpop.f32.mrb[13].mxu1  ;;  %v1424_v14 = vpop.f32.mrb[13].mxu0 }
 0x155   :  { %v1136_v16 = vpop.f32.mrb[14].mxu1  ;;  %v1425_v21 = vpop.f32.mrb[14].mxu0 }
 0x156   :  { %2505 = vst [vmem:[#allocation7 + $0x10] sm:$0xff] %v2357_v9   ;;  %v1423_v19 = vadd.f32 %v1422_v11, %v1134_v10  ;;  %v1137_v20 = vadd.f32 %v3058_v15, %v1136_v16  ;;  %v1138_v22 = vpop.f32.mrb[15].mxu1  ;;  %v1427_v24 = vpop.f32.mrb[15].mxu0 }
 0x158   :  { %v1426_v25 = vadd.f32 %v1425_v21, %v1137_v20  ;;  %1348 = vmatmul.mubr.bf16.gmra.mrb[120].mxu1 %v2887_v13  ;;  %1637 = vmatmul.mubr.bf16.gmra.mrb[120].mxu0 %v2888_v17  ;;  %v1659_v26 = vmax.f32 %v1423_v19, 0.0 }
 0x159   :  { %1355 = vmatprep.mubr.bf16.mxu1 %v2889_v18  ;;  %1644 = vmatprep.mubr.bf16.mxu0 %v2891_v23 }
 0x15a   :  { %v1660_v27 = vmax.f32 %v1426_v25, 0.0 }
 0x15b   :  { %v1141_v28 = vpop.f32.mrb[16].mxu1  ;;  %v1430_v31 = vpop.f32.mrb[16].mxu0 }
 0x15c   :  { %v2362_v29 = vpack.c.bf16 %v1660_v27, %v1659_v26  ;;  %v1142_v30 = vadd.f32 %v3058_v15, %v1141_v28  ;;  %v1143_v32 = vpop.f32.mrb[17].mxu1  ;;  %v1432_v34 = vpop.f32.mrb[17].mxu0 }
 0x15d   :  { %v1144_v35 = vpop.f32.mrb[18].mxu1  ;;  %v1433_v39 = vpop.f32.mrb[18].mxu0 }
 0x15e   :  { %2506 = vst [vmem:[#allocation7 + $0x18] sm:$0xff] %v2362_v29   ;;  %v1431_v37 = vadd.f32 %v1430_v31, %v1142_v30  ;;  %v1145_v38 = vadd.f32 %v3058_v15, %v1144_v35  ;;  %v1146_v40 = vpop.f32.mrb[19].mxu1  ;;  %v1435_v41 = vpop.f32.mrb[19].mxu0 }
 0x160   :  { %v1434_v42 = vadd.f32 %v1433_v39, %v1145_v38  ;;  %1356 = vmatmul.mubr.bf16.gmra.mrb[124].mxu1 %v2893_v33  ;;  %1645 = vmatmul.mubr.bf16.gmra.mrb[124].mxu0 %v2894_v36  ;;  %v1661_v43 = vmax.f32 %v1431_v37, 0.0 }
 0x162   :  { %v1662_v44 = vmax.f32 %v1434_v42, 0.0 }
 0x163   :  { %v1149_v45 = vpop.f32.mrb[20].mxu1  ;;  %v1438_v48 = vpop.f32.mrb[20].mxu0 }
 0x164   :  { %v2367_v46 = vpack.c.bf16 %v1662_v44, %v1661_v43  ;;  %v1150_v47 = vadd.f32 %v3058_v15, %v1149_v45  ;;  %v1151_v49 = vpop.f32.mrb[21].mxu1  ;;  %v1440_v50 = vpop.f32.mrb[21].mxu0 }
 0x165   :  { %v1152_v51 = vpop.f32.mrb[22].mxu1  ;;  %v1441_v54 = vpop.f32.mrb[22].mxu0 }
 0x166   :  { %2507 = vst [vmem:[#allocation7 + $0x20] sm:$0xff] %v2367_v46   ;;  %v1439_v52 = vadd.f32 %v1438_v48, %v1150_v47  ;;  %v1153_v53 = vadd.f32 %v3058_v15, %v1152_v51  ;;  %v1154_v55 = vpop.f32.mrb[23].mxu1  ;;  %v1443_v56 = vpop.f32.mrb[23].mxu0 }
 0x168   :  { %v1442_v57 = vadd.f32 %v1441_v54, %v1153_v53  ;;  %v1663_v58 = vmax.f32 %v1439_v52, 0.0 }
 0x16a   :  { %v1664_v59 = vmax.f32 %v1442_v57, 0.0 }
 0x16b   :  { %v1157_v60 = vpop.f32.mrb[24].mxu1  ;;  %v1446_v63 = vpop.f32.mrb[24].mxu0 }
 0x16c   :  { %v2372_v61 = vpack.c.bf16 %v1664_v59, %v1663_v58  ;;  %v1158_v62 = vadd.f32 %v3058_v15, %v1157_v60  ;;  %v1159_v0 = vpop.f32.mrb[25].mxu1  ;;  %v1448_v1 = vpop.f32.mrb[25].mxu0 }
 0x16d   :  { %v1160_v2 = vpop.f32.mrb[26].mxu1  ;;  %v1449_v5 = vpop.f32.mrb[26].mxu0 }
 0x16e   :  { %2508 = vst [vmem:[#allocation7 + $0x28] sm:$0xff] %v2372_v61   ;;  %v1447_v3 = vadd.f32 %v1446_v63, %v1158_v62  ;;  %v1161_v4 = vadd.f32 %v3058_v15, %v1160_v2  ;;  %v1162_v6 = vpop.f32.mrb[27].mxu1  ;;  %v1451_v7 = vpop.f32.mrb[27].mxu0 }
 0x170   :  { %v1450_v8 = vadd.f32 %v1449_v5, %v1161_v4  ;;  %v1665_v9 = vmax.f32 %v1447_v3, 0.0 }
 0x172   :  { %v1666_v10 = vmax.f32 %v1450_v8, 0.0 }
 0x173   :  { %v1165_v11 = vpop.f32.mrb[28].mxu1  ;;  %v1454_v14 = vpop.f32.mrb[28].mxu0 }
 0x174   :  { %v2377_v12 = vpack.c.bf16 %v1666_v10, %v1665_v9  ;;  %v1166_v13 = vadd.f32 %v3058_v15, %v1165_v11  ;;  %v1167_v16 = vpop.f32.mrb[29].mxu1  ;;  %v1456_v17 = vpop.f32.mrb[29].mxu0 }
 0x175   :  { %v1168_v18 = vpop.f32.mrb[30].mxu1  ;;  %v1457_v21 = vpop.f32.mrb[30].mxu0 }
 0x176   :  { %2509 = vst [vmem:[#allocation7 + $0x30] sm:$0xff] %v2377_v12   ;;  %v1455_v19 = vadd.f32 %v1454_v14, %v1166_v13  ;;  %v1169_v20 = vadd.f32 %v3058_v15, %v1168_v18  ;;  %v1170_v22 = vpop.f32.mrb[31].mxu1  ;;  %v1459_v23 = vpop.f32.mrb[31].mxu0 }
 0x178   :  { %v1458_v24 = vadd.f32 %v1457_v21, %v1169_v20  ;;  %v1667_v25 = vmax.f32 %v1455_v19, 0.0 }
 0x17a   :  { %v1668_v26 = vmax.f32 %v1458_v24, 0.0 }
 0x17b   :  { %v1173_v27 = vpop.f32.mrb[32].mxu1  ;;  %v1462_v30 = vpop.f32.mrb[32].mxu0 }
 0x17c   :  { %v2382_v28 = vpack.c.bf16 %v1668_v26, %v1667_v25  ;;  %v1174_v29 = vadd.f32 %v3058_v15, %v1173_v27  ;;  %v1175_v31 = vpop.f32.mrb[33].mxu1  ;;  %v1464_v32 = vpop.f32.mrb[33].mxu0 }
 0x17d   :  { %v1176_v33 = vpop.f32.mrb[34].mxu1  ;;  %v1465_v36 = vpop.f32.mrb[34].mxu0 }
 0x17e   :  { %2510 = vst [vmem:[#allocation7 + $0x38] sm:$0xff] %v2382_v28   ;;  %v1463_v34 = vadd.f32 %v1462_v30, %v1174_v29  ;;  %v1177_v35 = vadd.f32 %v3058_v15, %v1176_v33  ;;  %v1178_v37 = vpop.f32.mrb[35].mxu1  ;;  %v1467_v38 = vpop.f32.mrb[35].mxu0 }
 0x180   :  { %v1466_v39 = vadd.f32 %v1465_v36, %v1177_v35  ;;  %v1669_v40 = vmax.f32 %v1463_v34, 0.0 }
 0x182   :  { %v1670_v41 = vmax.f32 %v1466_v39, 0.0 }
 0x183   :  { %v1181_v42 = vpop.f32.mrb[36].mxu1  ;;  %v1470_v45 = vpop.f32.mrb[36].mxu0 }
 0x184   :  { %v2387_v43 = vpack.c.bf16 %v1670_v41, %v1669_v40  ;;  %v1182_v44 = vadd.f32 %v3058_v15, %v1181_v42  ;;  %v1183_v46 = vpop.f32.mrb[37].mxu1  ;;  %v1472_v47 = vpop.f32.mrb[37].mxu0 }
 0x185   :  { %v1184_v48 = vpop.f32.mrb[38].mxu1  ;;  %v1473_v51 = vpop.f32.mrb[38].mxu0 }
 0x186   :  { %2511 = vst [vmem:[#allocation7 + $0x40] sm:$0xff] %v2387_v43   ;;  %v1471_v49 = vadd.f32 %v1470_v45, %v1182_v44  ;;  %v1185_v50 = vadd.f32 %v3058_v15, %v1184_v48  ;;  %v1186_v52 = vpop.f32.mrb[39].mxu1  ;;  %v1475_v53 = vpop.f32.mrb[39].mxu0 }
 0x188   :  { %v1474_v54 = vadd.f32 %v1473_v51, %v1185_v50  ;;  %v1671_v55 = vmax.f32 %v1471_v49, 0.0 }
 0x18a   :  { %v1672_v56 = vmax.f32 %v1474_v54, 0.0 }
 0x18b   :  { %v1189_v57 = vpop.f32.mrb[40].mxu1  ;;  %v1478_v60 = vpop.f32.mrb[40].mxu0 }
 0x18c   :  { %v2392_v58 = vpack.c.bf16 %v1672_v56, %v1671_v55  ;;  %v1190_v59 = vadd.f32 %v3058_v15, %v1189_v57  ;;  %v1191_v61 = vpop.f32.mrb[41].mxu1  ;;  %v1480_v62 = vpop.f32.mrb[41].mxu0 }
 0x18d   :  { %v1192_v63 = vpop.f32.mrb[42].mxu1  ;;  %v1481_v2 = vpop.f32.mrb[42].mxu0 }
 0x18e   :  { %2512 = vst [vmem:[#allocation7 + $0x48] sm:$0xff] %v2392_v58   ;;  %v1479_v0 = vadd.f32 %v1478_v60, %v1190_v59  ;;  %v1193_v1 = vadd.f32 %v3058_v15, %v1192_v63  ;;  %v1194_v3 = vpop.f32.mrb[43].mxu1  ;;  %v1483_v4 = vpop.f32.mrb[43].mxu0 }
 0x190   :  { %v1482_v5 = vadd.f32 %v1481_v2, %v1193_v1  ;;  %v1673_v6 = vmax.f32 %v1479_v0, 0.0 }
 0x192   :  { %v1674_v7 = vmax.f32 %v1482_v5, 0.0 }
 0x193   :  { %v1197_v8 = vpop.f32.mrb[44].mxu1  ;;  %v1486_v11 = vpop.f32.mrb[44].mxu0 }
 0x194   :  { %v2397_v9 = vpack.c.bf16 %v1674_v7, %v1673_v6  ;;  %v1198_v10 = vadd.f32 %v3058_v15, %v1197_v8  ;;  %v1199_v12 = vpop.f32.mrb[45].mxu1  ;;  %v1488_v13 = vpop.f32.mrb[45].mxu0 }
 0x195   :  { %v1200_v14 = vpop.f32.mrb[46].mxu1  ;;  %v1489_v18 = vpop.f32.mrb[46].mxu0 }
 0x196   :  { %2513 = vst [vmem:[#allocation7 + $0x50] sm:$0xff] %v2397_v9   ;;  %v1487_v16 = vadd.f32 %v1486_v11, %v1198_v10  ;;  %v1201_v17 = vadd.f32 %v3058_v15, %v1200_v14  ;;  %v1202_v19 = vpop.f32.mrb[47].mxu1  ;;  %v1491_v20 = vpop.f32.mrb[47].mxu0 }
 0x198   :  { %v1490_v21 = vadd.f32 %v1489_v18, %v1201_v17  ;;  %v1675_v22 = vmax.f32 %v1487_v16, 0.0 }
 0x19a   :  { %v1676_v23 = vmax.f32 %v1490_v21, 0.0 }
 0x19b   :  { %v1205_v24 = vpop.f32.mrb[48].mxu1  ;;  %v1494_v27 = vpop.f32.mrb[48].mxu0 }
 0x19c   :  { %v2402_v25 = vpack.c.bf16 %v1676_v23, %v1675_v22  ;;  %v1206_v26 = vadd.f32 %v3058_v15, %v1205_v24  ;;  %v1207_v28 = vpop.f32.mrb[49].mxu1  ;;  %v1496_v29 = vpop.f32.mrb[49].mxu0 }
 0x19d   :  { %v1208_v30 = vpop.f32.mrb[50].mxu1  ;;  %v1497_v33 = vpop.f32.mrb[50].mxu0 }
 0x19e   :  { %2514 = vst [vmem:[#allocation7 + $0x58] sm:$0xff] %v2402_v25   ;;  %v1495_v31 = vadd.f32 %v1494_v27, %v1206_v26  ;;  %v1209_v32 = vadd.f32 %v3058_v15, %v1208_v30  ;;  %v1210_v34 = vpop.f32.mrb[51].mxu1  ;;  %v1499_v35 = vpop.f32.mrb[51].mxu0 }
 0x1a0   :  { %v1498_v36 = vadd.f32 %v1497_v33, %v1209_v32  ;;  %v1677_v37 = vmax.f32 %v1495_v31, 0.0 }
 0x1a2   :  { %v1678_v38 = vmax.f32 %v1498_v36, 0.0 }
 0x1a3   :  { %v1213_v39 = vpop.f32.mrb[52].mxu1  ;;  %v1502_v42 = vpop.f32.mrb[52].mxu0 }
 0x1a4   :  { %v2407_v40 = vpack.c.bf16 %v1678_v38, %v1677_v37  ;;  %v1214_v41 = vadd.f32 %v3058_v15, %v1213_v39  ;;  %v1215_v43 = vpop.f32.mrb[53].mxu1  ;;  %v1504_v44 = vpop.f32.mrb[53].mxu0 }
 0x1a5   :  { %v1216_v45 = vpop.f32.mrb[54].mxu1  ;;  %v1505_v48 = vpop.f32.mrb[54].mxu0 }
 0x1a6   :  { %2515 = vst [vmem:[#allocation7 + $0x60] sm:$0xff] %v2407_v40   ;;  %v1503_v46 = vadd.f32 %v1502_v42, %v1214_v41  ;;  %v1217_v47 = vadd.f32 %v3058_v15, %v1216_v45  ;;  %v1218_v49 = vpop.f32.mrb[55].mxu1  ;;  %v1507_v50 = vpop.f32.mrb[55].mxu0 }
 0x1a8   :  { %v1506_v51 = vadd.f32 %v1505_v48, %v1217_v47  ;;  %v1679_v52 = vmax.f32 %v1503_v46, 0.0 }
 0x1aa   :  { %v1680_v53 = vmax.f32 %v1506_v51, 0.0 }
 0x1ab   :  { %v1221_v54 = vpop.f32.mrb[56].mxu1  ;;  %v1510_v57 = vpop.f32.mrb[56].mxu0 }
 0x1ac   :  { %v2412_v55 = vpack.c.bf16 %v1680_v53, %v1679_v52  ;;  %v1222_v56 = vadd.f32 %v3058_v15, %v1221_v54  ;;  %v1223_v58 = vpop.f32.mrb[57].mxu1  ;;  %v1512_v59 = vpop.f32.mrb[57].mxu0 }
 0x1ad   :  { %v1224_v60 = vpop.f32.mrb[58].mxu1  ;;  %v1513_v63 = vpop.f32.mrb[58].mxu0 }
 0x1ae   :  { %2516 = vst [vmem:[#allocation7 + $0x68] sm:$0xff] %v2412_v55   ;;  %v1511_v61 = vadd.f32 %v1510_v57, %v1222_v56  ;;  %v1225_v62 = vadd.f32 %v3058_v15, %v1224_v60  ;;  %v1226_v0 = vpop.f32.mrb[59].mxu1  ;;  %v1515_v1 = vpop.f32.mrb[59].mxu0 }
 0x1b0   :  { %v1514_v2 = vadd.f32 %v1513_v63, %v1225_v62  ;;  %v1681_v3 = vmax.f32 %v1511_v61, 0.0 }
 0x1b2   :  { %v1682_v4 = vmax.f32 %v1514_v2, 0.0 }
 0x1b3   :  { %v1229_v5 = vpop.f32.mrb[60].mxu1  ;;  %v1518_v8 = vpop.f32.mrb[60].mxu0 }
 0x1b4   :  { %v2417_v6 = vpack.c.bf16 %v1682_v4, %v1681_v3  ;;  %v1230_v7 = vadd.f32 %v3058_v15, %v1229_v5  ;;  %v1231_v9 = vpop.f32.mrb[61].mxu1  ;;  %v1520_v10 = vpop.f32.mrb[61].mxu0 }
 0x1b5   :  { %v1232_v11 = vpop.f32.mrb[62].mxu1  ;;  %v1521_v14 = vpop.f32.mrb[62].mxu0 }
 0x1b6   :  { %2517 = vst [vmem:[#allocation7 + $0x70] sm:$0xff] %v2417_v6   ;;  %v1519_v12 = vadd.f32 %v1518_v8, %v1230_v7  ;;  %v1233_v13 = vadd.f32 %v3058_v15, %v1232_v11  ;;  %v1234_v16 = vpop.f32.mrb[63].mxu1  ;;  %v1523_v17 = vpop.f32.mrb[63].mxu0 }
 0x1b8   :  { %v1522_v18 = vadd.f32 %v1521_v14, %v1233_v13  ;;  %v1683_v19 = vmax.f32 %v1519_v12, 0.0 }
 0x1ba   :  { %v1684_v20 = vmax.f32 %v1522_v18, 0.0 }
 0x1bb   :  { %v1237_v21 = vpop.f32.mrb[64].mxu1  ;;  %v1526_v24 = vpop.f32.mrb[64].mxu0 }
 0x1bc   :  { %v2422_v22 = vpack.c.bf16 %v1684_v20, %v1683_v19  ;;  %v1238_v23 = vadd.f32 %v3058_v15, %v1237_v21  ;;  %v1239_v25 = vpop.f32.mrb[65].mxu1  ;;  %v1528_v26 = vpop.f32.mrb[65].mxu0 }
 0x1bd   :  { %v1240_v27 = vpop.f32.mrb[66].mxu1  ;;  %v1529_v30 = vpop.f32.mrb[66].mxu0 }
 0x1be   :  { %2518 = vst [vmem:[#allocation7 + $0x78] sm:$0xff] %v2422_v22   ;;  %v1527_v28 = vadd.f32 %v1526_v24, %v1238_v23  ;;  %v1241_v29 = vadd.f32 %v3058_v15, %v1240_v27  ;;  %v1242_v31 = vpop.f32.mrb[67].mxu1  ;;  %v1531_v32 = vpop.f32.mrb[67].mxu0 }
 0x1c0   :  { %v1530_v33 = vadd.f32 %v1529_v30, %v1241_v29  ;;  %v1685_v34 = vmax.f32 %v1527_v28, 0.0 }
 0x1c2   :  { %v1686_v35 = vmax.f32 %v1530_v33, 0.0 }
 0x1c3   :  { %v1245_v36 = vpop.f32.mrb[68].mxu1  ;;  %v1534_v39 = vpop.f32.mrb[68].mxu0 }
 0x1c4   :  { %v2427_v37 = vpack.c.bf16 %v1686_v35, %v1685_v34  ;;  %v1246_v38 = vadd.f32 %v3058_v15, %v1245_v36  ;;  %v1247_v40 = vpop.f32.mrb[69].mxu1  ;;  %v1536_v41 = vpop.f32.mrb[69].mxu0 }
 0x1c5   :  { %v1248_v42 = vpop.f32.mrb[70].mxu1  ;;  %v1537_v45 = vpop.f32.mrb[70].mxu0 }
 0x1c6   :  { %2519 = vst [vmem:[#allocation7 + $0x80] sm:$0xff] %v2427_v37   ;;  %v1535_v43 = vadd.f32 %v1534_v39, %v1246_v38  ;;  %v1249_v44 = vadd.f32 %v3058_v15, %v1248_v42  ;;  %v1250_v46 = vpop.f32.mrb[71].mxu1  ;;  %v1539_v47 = vpop.f32.mrb[71].mxu0 }
 0x1c8   :  { %v1538_v48 = vadd.f32 %v1537_v45, %v1249_v44  ;;  %v1687_v49 = vmax.f32 %v1535_v43, 0.0 }
 0x1ca   :  { %v1688_v50 = vmax.f32 %v1538_v48, 0.0 }
 0x1cb   :  { %v1253_v51 = vpop.f32.mrb[72].mxu1  ;;  %v1542_v54 = vpop.f32.mrb[72].mxu0 }
 0x1cc   :  { %v2432_v52 = vpack.c.bf16 %v1688_v50, %v1687_v49  ;;  %v1254_v53 = vadd.f32 %v3058_v15, %v1253_v51  ;;  %v1255_v55 = vpop.f32.mrb[73].mxu1  ;;  %v1544_v56 = vpop.f32.mrb[73].mxu0 }
 0x1cd   :  { %v1256_v57 = vpop.f32.mrb[74].mxu1  ;;  %v1545_v60 = vpop.f32.mrb[74].mxu0 }
 0x1ce   :  { %2520 = vst [vmem:[#allocation7 + $0x88] sm:$0xff] %v2432_v52   ;;  %v1543_v58 = vadd.f32 %v1542_v54, %v1254_v53  ;;  %v1257_v59 = vadd.f32 %v3058_v15, %v1256_v57  ;;  %v1258_v61 = vpop.f32.mrb[75].mxu1  ;;  %v1547_v62 = vpop.f32.mrb[75].mxu0 }
 0x1d0   :  { %v1546_v63 = vadd.f32 %v1545_v60, %v1257_v59  ;;  %v1689_v0 = vmax.f32 %v1543_v58, 0.0 }
 0x1d2   :  { %v1690_v1 = vmax.f32 %v1546_v63, 0.0 }
 0x1d3   :  { %v1261_v2 = vpop.f32.mrb[76].mxu1  ;;  %v1550_v5 = vpop.f32.mrb[76].mxu0 }
 0x1d4   :  { %v2437_v3 = vpack.c.bf16 %v1690_v1, %v1689_v0  ;;  %v1262_v4 = vadd.f32 %v3058_v15, %v1261_v2  ;;  %v1263_v6 = vpop.f32.mrb[77].mxu1  ;;  %v1552_v7 = vpop.f32.mrb[77].mxu0 }
 0x1d5   :  { %v1264_v8 = vpop.f32.mrb[78].mxu1  ;;  %v1553_v11 = vpop.f32.mrb[78].mxu0 }
 0x1d6   :  { %2521 = vst [vmem:[#allocation7 + $0x90] sm:$0xff] %v2437_v3   ;;  %v1551_v9 = vadd.f32 %v1550_v5, %v1262_v4  ;;  %v1265_v10 = vadd.f32 %v3058_v15, %v1264_v8  ;;  %v1266_v12 = vpop.f32.mrb[79].mxu1  ;;  %v1555_v13 = vpop.f32.mrb[79].mxu0 }
 0x1d8   :  { %v1554_v14 = vadd.f32 %v1553_v11, %v1265_v10  ;;  %v1691_v16 = vmax.f32 %v1551_v9, 0.0 }
 0x1da   :  { %v1692_v17 = vmax.f32 %v1554_v14, 0.0 }
 0x1db   :  { %v1269_v18 = vpop.f32.mrb[80].mxu1  ;;  %v1558_v21 = vpop.f32.mrb[80].mxu0 }
 0x1dc   :  { %v2442_v19 = vpack.c.bf16 %v1692_v17, %v1691_v16  ;;  %v1270_v20 = vadd.f32 %v3058_v15, %v1269_v18  ;;  %v1271_v22 = vpop.f32.mrb[81].mxu1  ;;  %v1560_v23 = vpop.f32.mrb[81].mxu0 }
 0x1dd   :  { %v1272_v24 = vpop.f32.mrb[82].mxu1  ;;  %v1561_v27 = vpop.f32.mrb[82].mxu0 }
 0x1de   :  { %2522 = vst [vmem:[#allocation7 + $0x98] sm:$0xff] %v2442_v19   ;;  %v1559_v25 = vadd.f32 %v1558_v21, %v1270_v20  ;;  %v1273_v26 = vadd.f32 %v3058_v15, %v1272_v24  ;;  %v1274_v28 = vpop.f32.mrb[83].mxu1  ;;  %v1563_v29 = vpop.f32.mrb[83].mxu0 }
 0x1e0   :  { %v1562_v30 = vadd.f32 %v1561_v27, %v1273_v26  ;;  %v1693_v31 = vmax.f32 %v1559_v25, 0.0 }
 0x1e2   :  { %v1694_v32 = vmax.f32 %v1562_v30, 0.0 }
 0x1e3   :  { %v1277_v33 = vpop.f32.mrb[84].mxu1  ;;  %v1566_v36 = vpop.f32.mrb[84].mxu0 }
 0x1e4   :  { %v2447_v34 = vpack.c.bf16 %v1694_v32, %v1693_v31  ;;  %v1278_v35 = vadd.f32 %v3058_v15, %v1277_v33  ;;  %v1279_v37 = vpop.f32.mrb[85].mxu1  ;;  %v1568_v38 = vpop.f32.mrb[85].mxu0 }
 0x1e5   :  { %v1280_v39 = vpop.f32.mrb[86].mxu1  ;;  %v1569_v42 = vpop.f32.mrb[86].mxu0 }
 0x1e6   :  { %2523 = vst [vmem:[#allocation7 + $0xa0] sm:$0xff] %v2447_v34   ;;  %v1567_v40 = vadd.f32 %v1566_v36, %v1278_v35  ;;  %v1281_v41 = vadd.f32 %v3058_v15, %v1280_v39  ;;  %v1282_v43 = vpop.f32.mrb[87].mxu1  ;;  %v1571_v44 = vpop.f32.mrb[87].mxu0 }
 0x1e8   :  { %v1570_v45 = vadd.f32 %v1569_v42, %v1281_v41  ;;  %v1695_v46 = vmax.f32 %v1567_v40, 0.0 }
 0x1ea   :  { %v1696_v47 = vmax.f32 %v1570_v45, 0.0 }
 0x1eb   :  { %v1285_v48 = vpop.f32.mrb[88].mxu1  ;;  %v1574_v51 = vpop.f32.mrb[88].mxu0 }
 0x1ec   :  { %v2452_v49 = vpack.c.bf16 %v1696_v47, %v1695_v46  ;;  %v1286_v50 = vadd.f32 %v3058_v15, %v1285_v48  ;;  %v1287_v52 = vpop.f32.mrb[89].mxu1  ;;  %v1576_v53 = vpop.f32.mrb[89].mxu0 }
 0x1ed   :  { %v1288_v54 = vpop.f32.mrb[90].mxu1  ;;  %v1577_v57 = vpop.f32.mrb[90].mxu0 }
 0x1ee   :  { %2524 = vst [vmem:[#allocation7 + $0xa8] sm:$0xff] %v2452_v49   ;;  %v1575_v55 = vadd.f32 %v1574_v51, %v1286_v50  ;;  %v1289_v56 = vadd.f32 %v3058_v15, %v1288_v54  ;;  %v1290_v58 = vpop.f32.mrb[91].mxu1  ;;  %v1579_v59 = vpop.f32.mrb[91].mxu0 }
 0x1f0   :  { %v1578_v60 = vadd.f32 %v1577_v57, %v1289_v56  ;;  %v1697_v61 = vmax.f32 %v1575_v55, 0.0 }
 0x1f2   :  { %v1698_v62 = vmax.f32 %v1578_v60, 0.0 }
 0x1f3   :  { %v1293_v63 = vpop.f32.mrb[92].mxu1  ;;  %v1582_v2 = vpop.f32.mrb[92].mxu0 }
 0x1f4   :  { %v2457_v0 = vpack.c.bf16 %v1698_v62, %v1697_v61  ;;  %v1294_v1 = vadd.f32 %v3058_v15, %v1293_v63  ;;  %v1295_v3 = vpop.f32.mrb[93].mxu1  ;;  %v1584_v4 = vpop.f32.mrb[93].mxu0 }
 0x1f5   :  { %v1296_v5 = vpop.f32.mrb[94].mxu1  ;;  %v1585_v8 = vpop.f32.mrb[94].mxu0 }
 0x1f6   :  { %2525 = vst [vmem:[#allocation7 + $0xb0] sm:$0xff] %v2457_v0   ;;  %v1583_v6 = vadd.f32 %v1582_v2, %v1294_v1  ;;  %v1297_v7 = vadd.f32 %v3058_v15, %v1296_v5  ;;  %v1298_v9 = vpop.f32.mrb[95].mxu1  ;;  %v1587_v10 = vpop.f32.mrb[95].mxu0 }
 0x1f8   :  { %v1586_v11 = vadd.f32 %v1585_v8, %v1297_v7  ;;  %v1699_v12 = vmax.f32 %v1583_v6, 0.0 }
 0x1fa   :  { %v1700_v13 = vmax.f32 %v1586_v11, 0.0 }
 0x1fb   :  { %v1301_v14 = vpop.f32.mrb[96].mxu1  ;;  %v1590_v18 = vpop.f32.mrb[96].mxu0 }
 0x1fc   :  { %v2462_v16 = vpack.c.bf16 %v1700_v13, %v1699_v12  ;;  %v1302_v17 = vadd.f32 %v3058_v15, %v1301_v14  ;;  %v1303_v19 = vpop.f32.mrb[97].mxu1  ;;  %v1592_v20 = vpop.f32.mrb[97].mxu0 }
 0x1fd   :  { %v1304_v21 = vpop.f32.mrb[98].mxu1  ;;  %v1593_v24 = vpop.f32.mrb[98].mxu0 }
 0x1fe   :  { %2526 = vst [vmem:[#allocation7 + $0xb8] sm:$0xff] %v2462_v16   ;;  %v1591_v22 = vadd.f32 %v1590_v18, %v1302_v17  ;;  %v1305_v23 = vadd.f32 %v3058_v15, %v1304_v21  ;;  %v1306_v25 = vpop.f32.mrb[99].mxu1  ;;  %v1595_v26 = vpop.f32.mrb[99].mxu0 }
 0x200   :  { %v1594_v27 = vadd.f32 %v1593_v24, %v1305_v23  ;;  %v1701_v28 = vmax.f32 %v1591_v22, 0.0 }
 0x202   :  { %v1702_v29 = vmax.f32 %v1594_v27, 0.0 }
 0x203   :  { %v1309_v30 = vpop.f32.mrb[100].mxu1  ;;  %v1598_v33 = vpop.f32.mrb[100].mxu0 }
 0x204   :  { %v2467_v31 = vpack.c.bf16 %v1702_v29, %v1701_v28  ;;  %v1310_v32 = vadd.f32 %v3058_v15, %v1309_v30  ;;  %v1311_v34 = vpop.f32.mrb[101].mxu1  ;;  %v1600_v35 = vpop.f32.mrb[101].mxu0 }
 0x205   :  { %v1312_v36 = vpop.f32.mrb[102].mxu1  ;;  %v1601_v39 = vpop.f32.mrb[102].mxu0 }
 0x206   :  { %2527 = vst [vmem:[#allocation7 + $0xc0] sm:$0xff] %v2467_v31   ;;  %v1599_v37 = vadd.f32 %v1598_v33, %v1310_v32  ;;  %v1313_v38 = vadd.f32 %v3058_v15, %v1312_v36  ;;  %v1314_v40 = vpop.f32.mrb[103].mxu1  ;;  %v1603_v41 = vpop.f32.mrb[103].mxu0 }
 0x208   :  { %v1602_v42 = vadd.f32 %v1601_v39, %v1313_v38  ;;  %v1703_v43 = vmax.f32 %v1599_v37, 0.0 }
 0x20a   :  { %v1704_v44 = vmax.f32 %v1602_v42, 0.0 }
 0x20b   :  { %v1317_v45 = vpop.f32.mrb[104].mxu1  ;;  %v1606_v48 = vpop.f32.mrb[104].mxu0 }
 0x20c   :  { %v2472_v46 = vpack.c.bf16 %v1704_v44, %v1703_v43  ;;  %v1318_v47 = vadd.f32 %v3058_v15, %v1317_v45  ;;  %v1319_v49 = vpop.f32.mrb[105].mxu1  ;;  %v1608_v50 = vpop.f32.mrb[105].mxu0  ;;  %v2895_v44 = vld [vmem:[%s3140_s2] ss:$0 sm:$0xff]  ;;  %s2975_s2 = smov [#allocation7]  }
 0x20d   :  { %v1320_v51 = vpop.f32.mrb[106].mxu1  ;;  %v1609_v54 = vpop.f32.mrb[106].mxu0  ;;  %s2042_s15 = sshll.u32 %s2975_s2, 4  ;;  %s2043_s15 = int_to_ptr.vmem [resolvable:$true] %s2042_s15 }
 0x20e   :  { %2528 = vst [vmem:[#allocation7 + $0xc8] sm:$0xff] %v2472_v46   ;;  %v1607_v52 = vadd.f32 %v1606_v48, %v1318_v47  ;;  %v1321_v53 = vadd.f32 %v3058_v15, %v1320_v51  ;;  %v1322_v55 = vpop.f32.mrb[107].mxu1  ;;  %v1611_v56 = vpop.f32.mrb[107].mxu0  ;;  %s2940_s16 = scalar_lea.vmem %s2043_s15, 4096  ;;  %p2945_p3 = scmp.lt.s32.totalorder %s2043_s15, %s2043_s15 }
 0x20f   :  { %p2941_p2 = scmp.ne.s32.totalorder %s2043_s15, %s2940_s16  ;;  %p2946_p4 = scmp.lt.s32.totalorder %s2940_s16, %s2940_s16 }
 0x210   :  { %v1610_v57 = vadd.f32 %v1609_v54, %v1321_v53  ;;  %v1705_v58 = vmax.f32 %v1607_v52, 0.0 }
 0x211   :  { %p2947_p5 = por %p2946_p4, %p2945_p3 }
 0x212   :  { %v1706_v59 = vmax.f32 %v1610_v57, 0.0 }
 0x213   :  { %v1325_v60 = vpop.f32.mrb[108].mxu1  ;;  %v1614_v63 = vpop.f32.mrb[108].mxu0  ;;  %p2948_p6 = pnand %p2947_p5, %p2941_p2 }
 0x214   :  { %v2477_v61 = vpack.c.bf16 %v1706_v59, %v1705_v58  ;;  %v1326_v62 = vadd.f32 %v3058_v15, %v1325_v60  ;;  %v1327_v0 = vpop.f32.mrb[109].mxu1  ;;  %v1616_v1 = vpop.f32.mrb[109].mxu0 }
 0x215   :  { %v1328_v2 = vpop.f32.mrb[110].mxu1  ;;  %v1617_v5 = vpop.f32.mrb[110].mxu0 }
 0x216   :  { %2529 = vst [vmem:[#allocation7 + $0xd0] sm:$0xff] %v2477_v61   ;;  %v1615_v3 = vadd.f32 %v1614_v63, %v1326_v62  ;;  %v1329_v4 = vadd.f32 %v3058_v15, %v1328_v2  ;;  %v1330_v6 = vpop.f32.mrb[111].mxu1  ;;  %v1619_v7 = vpop.f32.mrb[111].mxu0 }
 0x218   :  { %v1618_v8 = vadd.f32 %v1617_v5, %v1329_v4  ;;  %v1707_v9 = vmax.f32 %v1615_v3, 0.0 }
 0x21a   :  { %v1708_v10 = vmax.f32 %v1618_v8, 0.0 }
 0x21b   :  { %v1333_v11 = vpop.f32.mrb[112].mxu1  ;;  %v1622_v14 = vpop.f32.mrb[112].mxu0 }
 0x21c   :  { %v2482_v12 = vpack.c.bf16 %v1708_v10, %v1707_v9  ;;  %v1334_v13 = vadd.f32 %v3058_v15, %v1333_v11  ;;  %v1335_v16 = vpop.f32.mrb[113].mxu1  ;;  %v1624_v17 = vpop.f32.mrb[113].mxu0 }
 0x21d   :  { %v1336_v18 = vpop.f32.mrb[114].mxu1  ;;  %v1625_v21 = vpop.f32.mrb[114].mxu0 }
 0x21e   :  { %2530 = vst [vmem:[#allocation7 + $0xd8] sm:$0xff] %v2482_v12   ;;  %v1623_v19 = vadd.f32 %v1622_v14, %v1334_v13  ;;  %v1337_v20 = vadd.f32 %v3058_v15, %v1336_v18  ;;  %v1338_v22 = vpop.f32.mrb[115].mxu1  ;;  %v1627_v23 = vpop.f32.mrb[115].mxu0 }
 0x220   :  { %v1626_v24 = vadd.f32 %v1625_v21, %v1337_v20  ;;  %v1709_v25 = vmax.f32 %v1623_v19, 0.0 }
 0x222   :  { %v1710_v26 = vmax.f32 %v1626_v24, 0.0 }
 0x223   :  { %v1341_v27 = vpop.f32.mrb[116].mxu1  ;;  %v1630_v30 = vpop.f32.mrb[116].mxu0 }
 0x224   :  { %v2487_v28 = vpack.c.bf16 %v1710_v26, %v1709_v25  ;;  %v1342_v29 = vadd.f32 %v3058_v15, %v1341_v27  ;;  %v1343_v31 = vpop.f32.mrb[117].mxu1  ;;  %v1632_v32 = vpop.f32.mrb[117].mxu0 }
 0x225   :  { %v1344_v33 = vpop.f32.mrb[118].mxu1  ;;  %v1633_v36 = vpop.f32.mrb[118].mxu0 }
 0x226   :  { %2531 = vst [vmem:[#allocation7 + $0xe0] sm:$0xff] %v2487_v28   ;;  %v1631_v34 = vadd.f32 %v1630_v30, %v1342_v29  ;;  %v1345_v35 = vadd.f32 %v3058_v15, %v1344_v33  ;;  %v1346_v37 = vpop.f32.mrb[119].mxu1  ;;  %v1635_v38 = vpop.f32.mrb[119].mxu0 }
 0x228   :  { %v1634_v39 = vadd.f32 %v1633_v36, %v1345_v35  ;;  %v1711_v40 = vmax.f32 %v1631_v34, 0.0 }
 0x22a   :  { %v1712_v41 = vmax.f32 %v1634_v39, 0.0 }
 0x22b   :  { %v1349_v42 = vpop.f32.mrb[120].mxu1  ;;  %v1638_v46 = vpop.f32.mrb[120].mxu0 }
 0x22c   :  { %v2492_v43 = vpack.c.bf16 %v1712_v41, %v1711_v40  ;;  %v1350_v45 = vadd.f32 %v2895_v44, %v1349_v42  ;;  %v1351_v47 = vpop.f32.mrb[121].mxu1  ;;  %v1640_v48 = vpop.f32.mrb[121].mxu0 }
 0x22d   :  { %v1352_v49 = vpop.f32.mrb[122].mxu1  ;;  %v1641_v51 = vpop.f32.mrb[122].mxu0 }
 0x22e   :  { %2532 = vst [vmem:[#allocation7 + $0xe8] sm:$0xff] %v2492_v43   ;;  %v1639_v50 = vadd.f32 %v1638_v46, %v1350_v45  ;;  %v1353_v15 = vadd.f32 %v2895_v44, %v1352_v49  ;;  %v1354_v52 = vpop.f32.mrb[123].mxu1  ;;  %v1643_v53 = vpop.f32.mrb[123].mxu0 }
 0x230   :  { %v1642_v54 = vadd.f32 %v1641_v51, %v1353_v15  ;;  %v1713_v55 = vmax.f32 %v1639_v50, 0.0 }
 0x232   :  { %v1714_v56 = vmax.f32 %v1642_v54, 0.0 }
 0x233   :  { %v1357_v57 = vpop.f32.mrb[124].mxu1  ;;  %v1646_v60 = vpop.f32.mrb[124].mxu0 }
 0x234   :  { %v2497_v58 = vpack.c.bf16 %v1714_v56, %v1713_v55  ;;  %v1358_v59 = vadd.f32 %v2895_v44, %v1357_v57  ;;  %v1359_v61 = vpop.f32.mrb[125].mxu1  ;;  %v1648_v62 = vpop.f32.mrb[125].mxu0 }
 0x235   :  { %v1360_v63 = vpop.f32.mrb[126].mxu1  ;;  %v1649_v2 = vpop.f32.mrb[126].mxu0 }
 0x236   :  { %2533 = vst [vmem:[#allocation7 + $0xf0] sm:$0xff] %v2497_v58   ;;  %v1647_v0 = vadd.f32 %v1646_v60, %v1358_v59  ;;  %v1361_v1 = vadd.f32 %v2895_v44, %v1360_v63  ;;  %v1362_v3 = vpop.f32.mrb[127].mxu1  ;;  %v1651_v4 = vpop.f32.mrb[127].mxu0 }
 0x238   :  { %v1650_v5 = vadd.f32 %v1649_v2, %v1361_v1  ;;  %v1715_v6 = vmax.f32 %v1647_v0, 0.0 }
 0x23a   :  { %v1716_v7 = vmax.f32 %v1650_v5, 0.0 }
 0x23c   :  { %v2502_v8 = vpack.c.bf16 %v1716_v7, %v1715_v6 }
 0x23e   :  { %2534 = vst [vmem:[#allocation7 + $0xf8] sm:$0xff] %v2502_v8  }
 0x23f   :  { %2951 = shalt.err (!%p2948_p6)
}
 0x240   :  { %s2952_s19 = scalar_lea.hbm %s3141_s3, 4096 }
 0x241   :  { %p2953_p7 = scmp.ne.s32.totalorder %s3141_s3, %s2952_s19  ;;  %p2956_p8 = scmp.lt.u32.totalorder %s2952_s19, %s3141_s3 }
 0x243   :  { %p2958_p9 = pnand %p2956_p8, %p2953_p7 }
 0x245   :  { %2961 = shalt.err (!%p2958_p9)
}
 0x246   :  { %2048 = dma.vmem_to_hbm [thread:$0]  %s2043_s15, 4096, %s3141_s3, [#allocation4], %s2972_s0, %s2972_s0, %s2973_s9  }
 0x247   :  { %2966 = dma.done.wait [#allocation4], 4096  }
 0x248   :  { %2967 = vsyncadd [#allocation4], 4294963200 }
 0x249   :  { %2052 = vsyncpa [#allocation3], 1 }
 0x24a   :  { %2053 = vsyncpa [#allocation6], 1 }
 0x24b   :  { %2054 = vsyncpa [#allocation4], 1 }

</bundles_post_ra>
